<compile_context>
chip_gen: v6e
topology: v6e:2x2x1
jax: 0.10.0
libtpu: 0.0.40
codegen_flags: <defaults>
</compile_context>

<pallas_src>
import functools

import jax
import jax.numpy as jnp
from jax.experimental import pallas as pl
from jax.experimental.pallas import tpu as pltpu

_LANE = 128
_VMEM_BUDGET = 16 * 1024 * 1024   # conservative working-set target (all gens)
_VMEM_LIMIT = 32 * 1024 * 1024    # scoped VMEM limit handed to the compiler


def _round_up(x, m):
    return (x + m - 1) // m * m


def _largest_aligned_divisor(padded, cap, align=_LANE, prefer=256):
    """Largest tile <= cap that divides `padded` (a multiple of `align`),
    preferring tiles that are multiples of `prefer` (the 256x256 MXU pass size
    on v6e/v7x) unless the preferred tile is less than half the best one."""
    cap = max(align, min(cap, padded))
    best = align
    best_pref = None
    for t in range(align, cap + 1, align):
        if padded % t == 0:
            best = t
            if t % prefer == 0:
                best_pref = t
    if best_pref is not None and best_pref * 2 >= best:
        return best_pref
    return best


def _choose_m(M, tm_cap, want_multi):
    """Pick (tm, m_pad). `want_multi` keeps >= 2 M tiles when the N grid has
    a single tile, so both v7x TensorCores get parallel work."""
    if want_multi and M >= 2 * _LANE:
        tm_cap = min(tm_cap, _round_up(M, _LANE) // 2)
    if M <= tm_cap:
        m_pad = _round_up(M, 8)          # single M tile, minimal padding
        return m_pad, m_pad
    m_pad = _round_up(M, _LANE)
    tm = _largest_aligned_divisor(m_pad, tm_cap)
    return tm, m_pad


def _tile_config(M, k_pad, n_pad, x_bytes, out_bytes):
    """Budget-driven tile selection. Returns (tm, m_pad, tk, tn, multi_k)."""
    # N tile: lane-dense, cap at 512, prefer 256-multiples.
    tn = n_pad if n_pad <= 512 else _largest_aligned_divisor(n_pad, 512)

    def ws(tm, tk, multi_k):
        w = 2 * tm * tk * x_bytes        # double-buffered f32 activation tile
        w += 2 * tk * tn * 2             # double-buffered bf16 weight tile
        w += 2 * tm * tn * out_bytes     # double-buffered output tile
        if multi_k:
            w += tm * tn * 4             # f32 accumulator scratch
        return w

    # K tile: cover the whole (padded) contraction in one tile if a 256-row
    # activation tile still fits the budget; otherwise split K.
    if ws(min(256, _round_up(M, 8)), k_pad, False) <= _VMEM_BUDGET:
        tk, multi_k = k_pad, False
    else:
        k_cap = _LANE
        cand = 2 * _LANE
        while cand <= min(k_pad, 4096) and ws(256, cand, True) <= _VMEM_BUDGET:
            k_cap = cand
            cand += _LANE
        tk = _largest_aligned_divisor(k_pad, k_cap)
        multi_k = True

    # M tile: as large as the budget allows (weights are re-streamed once per
    # M tile, so bigger is better), capped so the parallel grid keeps >= 2
    # steps when the N grid collapses to a single tile.
    tm_cap = _LANE
    cand = 2 * _LANE
    while cand <= 2048 and ws(cand, tk, multi_k) <= _VMEM_BUDGET:
        tm_cap = cand
        cand += _LANE
    want_multi = (tn == n_pad)
    tm, m_pad = _choose_m(M, tm_cap, want_multi)
    return tm, m_pad, tk, tn, multi_k


def _linear_relu_kernel(x_ref, wt_ref, o_ref):
    # Single-K-tile path: no reduction axis, no scratch, no pl.when.
    acc = jnp.dot(x_ref[...].astype(wt_ref.dtype), wt_ref[...],
                  preferred_element_type=jnp.float32)
    o_ref[...] = jnp.maximum(acc, 0.0).astype(o_ref.dtype)


def _linear_relu_kernel_multik(x_ref, wt_ref, o_ref, acc_ref):
    # Fallback for very large K: f32 VMEM accumulator, K axis last/"arbitrary".
    k = pl.program_id(2)

    @pl.when(k == 0)
    def _():
        acc_ref[...] = jnp.zeros_like(acc_ref)

    acc_ref[...] += jnp.dot(x_ref[...].astype(wt_ref.dtype), wt_ref[...],
                            preferred_element_type=jnp.float32)

    @pl.when(k == pl.num_programs(2) - 1)
    def _():
        o_ref[...] = jnp.maximum(acc_ref[...], 0.0).astype(o_ref.dtype)


@functools.partial(jax.jit, static_argnames=("n_out",))
def _linear_relu_pallas(x2d, w_t_pad, *, n_out):
    """relu(x2d @ W.T) where w_t_pad is the pre-padded, pre-cast (K_pad, N_pad)
    transposed weight.  x2d stays in its HBM dtype (cast on the fly in-kernel)."""
    M, K = x2d.shape
    k_pad, n_pad = w_t_pad.shape
    out_dtype = x2d.dtype
    x_bytes = x2d.dtype.itemsize
    out_bytes = jnp.dtype(out_dtype).itemsize

    tm, m_pad, tk, tn, multi_k = _tile_config(M, k_pad, n_pad, x_bytes, out_bytes)

    xc = x2d
    if (m_pad, k_pad) != (M, K):
        # Only hit when M / K are not already tile multiples.
        xc = jnp.pad(xc, ((0, m_pad - M), (0, k_pad - K)))

    m_tiles = m_pad // tm
    n_tiles = n_pad // tn

    cost = pl.CostEstimate(
        flops=2 * m_pad * n_pad * k_pad,
        transcendentals=0,
        bytes_accessed=(m_pad * k_pad * x_bytes * n_tiles
                        + k_pad * n_pad * 2 * m_tiles
                        + m_pad * n_pad * out_bytes),
    )

    if not multi_k:
        y = pl.pallas_call(
            _linear_relu_kernel,
            out_shape=jax.ShapeDtypeStruct((m_pad, n_pad), out_dtype),
            grid_spec=pltpu.PrefetchScalarGridSpec(
                num_scalar_prefetch=0,
                grid=(m_tiles, n_tiles),
                in_specs=[
                    pl.BlockSpec((tm, k_pad), lambda i, j: (i, 0)),
                    pl.BlockSpec((k_pad, tn), lambda i, j: (0, j)),
                ],
                out_specs=pl.BlockSpec((tm, tn), lambda i, j: (i, j)),
            ),
            compiler_params=pltpu.CompilerParams(
                dimension_semantics=("parallel", "parallel"),
                vmem_limit_bytes=_VMEM_LIMIT,
            ),
            cost_estimate=cost,
        )(xc, w_t_pad)
    else:
        k_tiles = k_pad // tk
        y = pl.pallas_call(
            _linear_relu_kernel_multik,
            out_shape=jax.ShapeDtypeStruct((m_pad, n_pad), out_dtype),
            grid_spec=pltpu.PrefetchScalarGridSpec(
                num_scalar_prefetch=0,
                grid=(m_tiles, n_tiles, k_tiles),
                in_specs=[
                    pl.BlockSpec((tm, tk), lambda i, j, k: (i, k)),
                    pl.BlockSpec((tk, tn), lambda i, j, k: (k, j)),
                ],
                out_specs=pl.BlockSpec((tm, tn), lambda i, j, k: (i, j)),
                scratch_shapes=[pltpu.VMEM((tm, tn), jnp.float32)],
            ),
            compiler_params=pltpu.CompilerParams(
                dimension_semantics=("parallel", "parallel", "arbitrary"),
                vmem_limit_bytes=_VMEM_LIMIT,
            ),
            cost_estimate=cost,
        )(xc, w_t_pad)

    if (m_pad, n_pad) != (M, n_out):
        y = y[:M, :n_out]
    return y


class NetLM:
    """JAX/Pallas port of the PyTorch NetLM module (two bias-free linears + ReLU)."""

    # Below this many MACs the pallas_call launch/pipeline overhead dominates;
    # let fused XLA handle it (same bf16/f32 numerics, so results match).
    _PALLAS_MIN_MACS = 256 * 256 * 256

    def __init__(self, input_emb_size, output_emb_size, key,
                 compute_dtype="bfloat16"):
        k1, k2 = jax.random.split(key)
        bound = 1.0 / (input_emb_size ** 0.5)
        cdt = jnp.dtype(compute_dtype)
        k_pad = _round_up(input_emb_size, _LANE)
        n_pad = _round_up(output_emb_size, _LANE)

        def make_weight(k):
            # nn.Linear default init: U(+/- 1/sqrt(fan_in)), layout (N, K).
            w = jax.random.uniform(k, (output_emb_size, input_emb_size),
                                   jnp.float32, -bound, bound)
            # Store only the (K_pad, N_pad) transposed, zero-padded, compute-
            # dtype copy: this is the single weight HBM footprint and removes
            # any per-call transpose/pad/cast from the forward path.
            wt = jnp.zeros((k_pad, n_pad), cdt)
            return wt.at[:input_emb_size, :output_emb_size].set(w.T.astype(cdt))

        self.input_emb_size = input_emb_size
        self.output_emb_size = output_emb_size
        self.compute_dtype = cdt
        self.w_key_t = make_weight(k1)
        self.w_value_t = make_weight(k2)

    def __call__(self, x, name):
        if name == "key":
            w_t = self.w_key_t
        elif name == "value":
            w_t = self.w_value_t
        else:
            # PyTorch forward returns x unchanged for any other name.
            return x

        K, N = self.input_emb_size, self.output_emb_size
        orig_shape = x.shape
        x2d = x.reshape(-1, K)
        M = x2d.shape[0]

        if M * K * N < self._PALLAS_MIN_MACS:
            # Tiny problem: XLA fused matmul+ReLU, with the SAME bf16-operand /
            # f32-accumulation numerics as the kernel path.
            y2d = jnp.maximum(
                jnp.dot(x2d.astype(self.compute_dtype), w_t[:K, :N],
                        preferred_element_type=jnp.float32),
                0.0).astype(x.dtype)
        else:
            y2d = _linear_relu_pallas(x2d, w_t, n_out=N)
        return y2d.reshape(*orig_shape[:-1], N)


if __name__ == "__main__":
    root = jax.random.PRNGKey(0)
    k_param1, k_param2, k_x1, k_x2, k_x3 = jax.random.split(root, 5)

    def ref_forward(xx, w_t_pad, K, N):
        # Same bf16-quantized weights the kernel uses; f32 accumulation.
        xb = xx.reshape(-1, K).astype(jnp.bfloat16).astype(jnp.float32)
        wb = w_t_pad[:K, :N].astype(jnp.float32)
        y = jnp.maximum(
            jnp.dot(xb, wb, precision=jax.lax.Precision.HIGHEST), 0.0)
        return y.reshape(*xx.shape[:-1], N)

    # --- Test 1: single-K-tile kernel path (K fits VMEM in one tile) -------
    batch, seq, in_emb, out_emb = 4, 192, 640, 384
    net = NetLM(in_emb, out_emb, k_param1)
    x = jax.random.normal(k_x1, (batch, seq, in_emb), jnp.float32)

    y_key = net(x, "key")
    y_value = net(x, "value")
    y_other = net(x, "other")  # identity branch
    jax.block_until_ready((y_key, y_value, y_other))

    assert y_key.shape == (batch, seq, out_emb)
    assert y_value.shape == (batch, seq, out_emb)
    assert y_other.shape == x.shape and bool(jnp.array_equal(y_other, x))
    assert jnp.allclose(y_key, ref_forward(x, net.w_key_t, in_emb, out_emb),
                        atol=2e-3, rtol=2e-3), "key branch mismatch"
    assert jnp.allclose(y_value, ref_forward(x, net.w_value_t, in_emb, out_emb),
                        atol=2e-3, rtol=2e-3), "value branch mismatch"

    # --- Test 2: multi-K-tile kernel path (large contraction dim) ----------
    in_emb2, out_emb2 = 6144, 256
    net2 = NetLM(in_emb2, out_emb2, k_param2)
    x2 = jax.random.normal(k_x2, (2, 128, in_emb2), jnp.float32)
    y2 = net2(x2, "key")
    jax.block_until_ready(y2)
    assert y2.shape == (2, 128, out_emb2)
    assert jnp.allclose(y2, ref_forward(x2, net2.w_key_t, in_emb2, out_emb2),
                        atol=5e-3, rtol=5e-3), "multi-K path mismatch"

    # --- Test 3: tiny-shape dispatch path (pure XLA fallback) --------------
    x_small = jax.random.normal(k_x3, (2, 3, in_emb), jnp.float32)
    y_small = net(x_small, "key")
    jax.block_until_ready(y_small)
    assert jnp.allclose(y_small, ref_forward(x_small, net.w_key_t, in_emb, out_emb),
                        atol=2e-3, rtol=2e-3), "fallback path mismatch"

    print("KERNEL_OK")
</pallas_src>

<mosaic_0001>
module attributes {stable_mosaic.version = 11 : i64} {
  func.func @_linear_relu_kernel(%arg0: i32, %arg1: i32, %arg2: memref<256x640xf32, #tpu.memory_space<vmem>>, %arg3: memref<640x384xbf16, #tpu.memory_space<vmem>>, %arg4: memref<256x384xf32, #tpu.memory_space<vmem>>) attributes {dimension_semantics = [#tpu.dimension_semantics<parallel>, #tpu.dimension_semantics<parallel>], iteration_bounds = array<i64: 3, 1>, scalar_prefetch = 0 : i64, scratch_operands = 0 : i64, tpu.core_type = #tpu.core_type<tc>, window_params = [{transform_indices = @transform_0, window_bounds = array<i64: 256, 640>}, {transform_indices = @transform_1, window_bounds = array<i64: 640, 384>}, {transform_indices = @transform_2, window_bounds = array<i64: 256, 384>}]} {
    %c0 = arith.constant 0 : index
    %c0_0 = arith.constant 0 : index
    %0 = vector.load %arg2[%c0, %c0_0] : memref<256x640xf32, #tpu.memory_space<vmem>>, vector<256x640xf32>
    %1 = arith.truncf %0 : vector<256x640xf32> to vector<256x640xbf16>
    %c0_1 = arith.constant 0 : index
    %c0_2 = arith.constant 0 : index
    %2 = vector.load %arg3[%c0_1, %c0_2] : memref<640x384xbf16, #tpu.memory_space<vmem>>, vector<640x384xbf16>
    %cst = arith.constant dense<0.000000e+00> : vector<256x384xf32>
    %3 = tpu.matmul %1, %2, %cst {dimension_numbers = #tpu.dot_dimension_numbers<[1], [0], [0], [1], [0, 0, 1, 1], [], []>} : vector<256x640xbf16>, vector<640x384xbf16>, vector<256x384xf32> -> vector<256x384xf32>
    %cst_3 = arith.constant 0.000000e+00 : f32
    %4 = vector.broadcast %cst_3 : f32 to vector<256x384xf32>
    %5 = arith.maximumf %3, %4 : vector<256x384xf32>
    %c0_4 = arith.constant 0 : index
    %c0_5 = arith.constant 0 : index
    %6 = vector.load %arg4[%c0_4, %c0_5] : memref<256x384xf32, #tpu.memory_space<vmem>>, vector<256x384xf32>
    tpu.vector_store %arg4[%c0_4, %c0_5], %5 {strides = array<i32>} : memref<256x384xf32, #tpu.memory_space<vmem>>, vector<256x384xf32>,
    return
  }
  func.func @transform_0(%arg0: i32, %arg1: i32) -> (i32, i32) {
    %c0_i32 = arith.constant 0 : i32
    %c0_i32_0 = arith.constant 0 : i32
    return %arg0, %c0_i32 : i32, i32
  }
  func.func @transform_1(%arg0: i32, %arg1: i32) -> (i32, i32) {
    %c0_i32 = arith.constant 0 : i32
    %c0_i32_0 = arith.constant 0 : i32
    return %c0_i32, %arg1 : i32, i32
  }
  func.func @transform_2(%arg0: i32, %arg1: i32) -> (i32, i32) {
    %c0_i32 = arith.constant 0 : i32
    return %arg0, %arg1 : i32, i32
  }
}

</mosaic_0001>

<bundles_post_ra>
// kernel: _linear_relu_pallas.1
= control target key start
LH: loop header
LB: loop body
LE: loop exit
PB: predicated region body
PF: predicated region fallthrough
CT: control target
= control target key end

     0   :  { %7 = vsyncpa [#allocation3], 0  ;;  %s4669_s0 = inlined_call_operand.hbm [shape: f32[768,640], index: 0, kind: input, shape index: {}]   ;;  %s4670_s1 = inlined_call_operand.hbm [shape: bf16[640,384], index: 1, kind: input, shape index: {}]   ;;  %s4671_s2 = inlined_call_operand.hbm [shape: f32[768,384], index: 2, kind: output, shape index: {}]  }
   0x1   :  { %9 = vsyncpa [#allocation3 + $0x1], 0 }
   0x2   :  { %10 = vsyncpa [#allocation6], 0 }
   0x3   :  { %11 = vsyncpa [#allocation4], 0 }
   0x4   :  { %13 = vsyncpa [#allocation4 + $0x1], 0  ;;  %s3469_s9 = smov 0   ;;  %s3471_s10 = smov 0  }
   0x5   :  { %s3473_s11 = smov 0   ;;  %s3475_s12 = smov 0  }
   0x6   :  { %s3477_s13 = smov 0   ;;  %s3479_s14 = smov 0  }
   0x7 LB: > { %s2612_s15 = sadd.s32 4294967295, %s3442_s14   ;;  %s2613_s16 = sadd.s32 4294967294, %s3442_s14   ;;  %s3442_s14 = sphi %s3479_s14, %s19_s14   ;;  %s3438_s13 = sphi %s3477_s13, %s4845_s13   ;;  %s3434_s12 = sphi %s3475_s12, %s4844_s12   ;;  %s3430_s11 = sphi %s3473_s11, %s4843_s11   ;;  %s3426_s10 = sphi %s3471_s10, %s4842_s10   ;;  %s3422_s9 = sphi %s3469_s9, %s4841_s9  }
   0x8   : > { %p51_p0 = scmp.ne.s32.totalorder %s3426_s10, %s3422_s9  ;;  %p3503_p1 = scmp.eq.s32.totalorder %s2612_s15, 0 }
   0x9   : > { %p3507_p2 = scmp.eq.s32.totalorder %s2612_s15, 2  ;;  %p109_p3 = scmp.eq.s32.totalorder %s2613_s16, 2 }
   0xa   : > { %p3513_p4 = por %p3503_p1, %p51_p0  ;;  %p2614_p5 = scmp.ge.s32.totalorder %s3442_s14, 1 }
   0xb   : > { %p3518_p6 = por %p109_p3, %p51_p0  ;;  %p116_p7 = scmp.lt.s32.totalorder %s3442_s14, 4 }
   0xc   : > { %s3444_s22 = smov [#allocation5]   ;;  %s31_s25 = sadd.s32 1, %s3438_s13 }
   0xd   : > { %s4700_s20 = scalar_select %p3518_p6, 1, 0 }
   0xe   : > { %p3523_p8 = pnand %p2614_p5, %p116_p7  ;;  %s131_s23 = sshll.u32 %s3444_s22, 4  ;;  %s132_s23 = int_to_ptr.vmem [resolvable:$true] %s131_s23 }
   0xf   : > { %s3315_s26 = scalar_lea.vmem %s132_s23, 15360  ;;  %p3323_p3 = scmp.lt.s32.totalorder %s132_s23, %s132_s23 }
  0x10   : > { %p3072_p9 = pneg %p3523_p8  ;;  %p3316_p12 = scmp.ne.s32.totalorder %s132_s23, %s3315_s26 }
  0x11   : > { %p3324_p5 = scmp.lt.s32.totalorder %s3315_s26, %s3315_s26 }
  0x12   : > { %p3531_p10 = pnand %p3072_p9, %p3503_p1 }
  0x13   : > { %p3325_p7 = por %p3324_p5, %p3323_p3 }
  0x14   : > { %p3306_p11 = pneg %p3531_p10 }
  0x16   : > { %p3318_p13 = pnand %p3316_p12, %p3306_p11 }
  0x18   : > { %p3319_p0 = pneg %p3318_p13 }
  0x1a   : > { %p3326_p6 = pnand %p3325_p7, %p3319_p0 }
  0x1c   : > { %3329 = shalt.err (!%p3326_p6)
}
  0x1d   : > { %s3445_s27 = smov 192   ;;  %s3446_s28 = smov 12  }
  0x1e   : > { %3075 = dma.hbm_to_vmem [thread:$0]  (!%p3531_p10), %s4670_s1, 15360, %s132_s23, [#allocation6], %s3445_s27, %s3445_s27, %s3446_s28  }
  0x1f   : > { %p33_p9 = scmp.ge.s32.totalorder %s31_s25, 3  ;;  %s38_s3 = sadd.s32 1, %s3430_s11 }
  0x20   : > { %p45_p6 = scmp.ne.s32.totalorder %s3430_s11, %s3426_s10  ;;  %p46_p11 = scmp.eq.s32.totalorder %s3442_s14, 0 }
  0x21   : > { %s4847_s25 = smov (%p33_p9, %s31_s25), 0  ;;  %p3085_p0 = scmp.lt.s32.totalorder %s3442_s14, 3 }
  0x22   : > { %p47_p12 = por %p46_p11, %p45_p6  ;;  %p3551_p13 = por %p3507_p2, %p45_p6 }
  0x23   : > { %s35_s5 = ssub.s32 %s3438_s13, %s4847_s25  ;;  %s145_s6 = sand.u32 1, %s3430_s11  }
  0x24   : > { %p36_p3 = scmp.eq.s32.totalorder %s35_s5, 0  ;;  %s3059_s7 = smul.u32 1280, %s145_s6 }
  0x25   : > { %s3060_s15 = smul.u32 20480, %s3438_s13  ;;  %p3563_p10 = pnand %p3085_p0, %p47_p12 }
  0x26   : > { %s3560_s8 = scalar_select %p36_p3, %s3430_s11, %s38_s3  }
  0x27   : > { %s149_s16 = scalar_lea.vmem [#allocation2], %s3059_s7  ;;  %s156_s26 = scalar_lea.hbm %s4669_s0, %s3060_s15 }
  0x28   : > { %s157_s22 = sshll.u32 %s149_s16, 4  ;;  %s146_s27 = scalar_lea.sflag [#allocation3], %s145_s6  ;;  %s158_s22 = int_to_ptr.vmem [resolvable:$true] %s157_s22 }
  0x29   : > { %p3332_p2 = pneg %p3563_p10  ;;  %s3343_s28 = scalar_lea.vmem %s158_s22, 20480 }
  0x2a   : > { %p3344_p5 = scmp.ne.s32.totalorder %s158_s22, %s3343_s28  ;;  %s3447_s29 = smov [#allocation2]  }
  0x2b   : > { %s3348_s30 = sshll.u32 %s3447_s29, 4  ;;  %s3349_s30 = int_to_ptr.vmem [resolvable:$false] %s3348_s30 }
  0x2c   : > { %p3346_p7 = pnand %p3344_p5, %p3332_p2  ;;  %s3350_s3 = scalar_lea.vmem %s3349_s30, 40960 }
  0x2d   : > { %p3351_p6 = scmp.lt.s32.totalorder %s158_s22, %s3349_s30  ;;  %p3352_p11 = scmp.lt.s32.totalorder %s3350_s3, %s3343_s28 }
  0x2e   : > { %p3347_p9 = pneg %p3346_p7 }
  0x2f   : > { %p3353_p12 = por %p3352_p11, %p3351_p6 }
  0x31   : > { %p3354_p0 = pnand %p3353_p12, %p3347_p9 }
  0x33   : > { %3357 = shalt.err (!%p3354_p0)
}
  0x34   : > { %s3448_s5 = smov 640   ;;  %s3449_s7 = smov 40  }
  0x35   : > { %3079 = dma.hbm_to_vmem [thread:$0]  (!%p3563_p10), %s156_s26, 20480, %s158_s22, %s146_s27, %s3448_s5, %s3448_s5, %s3449_s7  }
  0x36   : > { %169 = sbr.rel (%p3523_p8) target bundleno = 696 (0x2b8), region = 28 }
  0x3b   : > { %s3577_s6 = sand.u32 1, %s3426_s10  }
  0x3c   : > { %s3061_s15 = smul.u32 1280, %s3577_s6  ;;  %s172_s16 = scalar_lea.sflag [#allocation3], %s3577_s6 }
  0x3e   : > { %s3581_s24 = scalar_lea.vmem [#allocation2], %s3061_s15 }
  0x3f   : > { %3409 = dma.done.wait (%p3513_p4), %s172_s16, 20480  }
  0x40   : > { %3411 = vsyncadd (%p3513_p4), %s172_s16, 4294946816 }
  0x41   : > { %3413 = dma.done.wait (%p3503_p1), [#allocation6], 15360  }
  0x42   : > { %3415 = vsyncadd (%p3503_p1), [#allocation6], 4294951936  ;;  %v3144_v0 = vld [vmem:[#allocation5 + $0xac] ss:$12 sps:$4 sm:$0xff]   ;;  %v3148_v2 = vld [vmem:[#allocation5 + $0xa8] ss:$12 sps:$4 sm:$0xff]  }
  0x43   : > { %v3146_v1 = vld [vmem:[#allocation5 + $0x22c] ss:$12 sps:$4 sm:$0xff]   ;;  %1245 = vmatprep.subr.bf16.mxu0 %v3144_v0  ;;  %v3149_v3 = vld [vmem:[#allocation5 + $0x228] ss:$12 sps:$4 sm:$0xff]   ;;  %v3154_v6 = vld [vmem:[#allocation5 + $0x90] ss:$12 sps:$4 sm:$0xff]  }
  0x44   : > { %1438 = vmatprep.subr.bf16.mxu1 %v3146_v1  ;;  %v3150_v4 = vld [vmem:[#allocation5 + $0x94] ss:$12 sps:$4 sm:$0xff]   ;;  %1246 = vmatpush1.bf16.msra.mxu0 %v3148_v2  ;;  %v3155_v7 = vld [vmem:[#allocation5 + $0x210] ss:$12 sps:$4 sm:$0xff]   ;;  %v3160_v10 = vld [vmem:[#allocation5 + $0x78] ss:$12 sps:$4 sm:$0xff]  }
  0x45   : > { %1439 = vmatpush1.bf16.msra.mxu1 %v3149_v3  ;;  %v3152_v5 = vld [vmem:[#allocation5 + $0x214] ss:$12 sps:$4 sm:$0xff]   ;;  %1247 = vmatprep.subr.bf16.mxu0 %v3150_v4  ;;  %v3156_v8 = vld [vmem:[#allocation5 + $0x7c] ss:$12 sps:$4 sm:$0xff]   ;;  %v3161_v11 = vld [vmem:[#allocation5 + $0x1f8] ss:$12 sps:$4 sm:$0xff]  }
  0x46   : > { %1440 = vmatprep.subr.bf16.mxu1 %v3152_v5  ;;  %v3158_v9 = vld [vmem:[#allocation5 + $0x1fc] ss:$12 sps:$4 sm:$0xff]   ;;  %v3162_v12 = vld [vmem:[#allocation5 + $0x64] ss:$12 sps:$4 sm:$0xff]   ;;  %v3166_v14 = vld [vmem:[#allocation5 + $0x60] ss:$12 sps:$4 sm:$0xff]  }
  0x47   : > { %v3164_v13 = vld [vmem:[#allocation5 + $0x1e4] ss:$12 sps:$4 sm:$0xff]   ;;  %v3167_v15 = vld [vmem:[#allocation5 + $0x1e0] ss:$12 sps:$4 sm:$0xff]   ;;  %v3172_v18 = vld [vmem:[#allocation5 + $0x48] ss:$12 sps:$4 sm:$0xff]  }
  0x48   : > { %1248 = vmatpush1.bf16.msra.mxu0 %v3154_v6  ;;  %v3168_v16 = vld [vmem:[#allocation5 + $0x4c] ss:$12 sps:$4 sm:$0xff]   ;;  %v3173_v19 = vld [vmem:[#allocation5 + $0x1c8] ss:$12 sps:$4 sm:$0xff]   ;;  %v3178_v22 = vld [vmem:[#allocation5 + $0x30] ss:$12 sps:$4 sm:$0xff]  }
  0x49   : > { %1441 = vmatpush1.bf16.msra.mxu1 %v3155_v7  ;;  %1249 = vmatprep.subr.bf16.mxu0 %v3156_v8  ;;  %v3170_v17 = vld [vmem:[#allocation5 + $0x1cc] ss:$12 sps:$4 sm:$0xff]   ;;  %v3174_v20 = vld [vmem:[#allocation5 + $0x34] ss:$12 sps:$4 sm:$0xff]   ;;  %v3179_v23 = vld [vmem:[#allocation5 + $0x1b0] ss:$12 sps:$4 sm:$0xff]  }
  0x4a   : > { %1442 = vmatprep.subr.bf16.mxu1 %v3158_v9  ;;  %v3176_v21 = vld [vmem:[#allocation5 + $0x1b4] ss:$12 sps:$4 sm:$0xff]   ;;  %v3180_v24 = vld [vmem:[#allocation5 + $0x1c] ss:$12 sps:$4 sm:$0xff]   ;;  %v3184_v26 = vld [vmem:[#allocation5 + $0x18] ss:$12 sps:$4 sm:$0xff]  }
  0x4b   : > { %v3182_v25 = vld [vmem:[#allocation5 + $0x19c] ss:$12 sps:$4 sm:$0xff]   ;;  %v3185_v27 = vld [vmem:[#allocation5 + $0x198] ss:$12 sps:$4 sm:$0xff]   ;;  %v3190_v30 = vld [vmem:[#allocation5] ss:$12 sps:$4 sm:$0xff]  }
  0x4c   : > { %1250 = vmatpush1.bf16.msra.mxu0 %v3160_v10  ;;  %v3186_v28 = vld [vmem:[#allocation5 + $0x4] ss:$12 sps:$4 sm:$0xff]   ;;  %v3191_v31 = vld [vmem:[#allocation5 + $0x180] ss:$12 sps:$4 sm:$0xff]   ;;  %v3196_v34 = vld [vmem:[#allocation5 + $0x168] ss:$12 sps:$4 sm:$0xff]  }
  0x4d   : > { %1443 = vmatpush1.bf16.msra.mxu1 %v3161_v11  ;;  %1251 = vmatprep.subr.bf16.mxu0 %v3162_v12  ;;  %v3188_v29 = vld [vmem:[#allocation5 + $0x184] ss:$12 sps:$4 sm:$0xff]   ;;  %v3192_v32 = vld [vmem:[#allocation5 + $0x16c] ss:$12 sps:$4 sm:$0xff]   ;;  %v3197_v35 = vld [vmem:[#allocation5 + $0x2e8] ss:$12 sps:$4 sm:$0xff]  }
  0x4e   : > { %1444 = vmatprep.subr.bf16.mxu1 %v3164_v13  ;;  %v3194_v33 = vld [vmem:[#allocation5 + $0x2ec] ss:$12 sps:$4 sm:$0xff]   ;;  %v3198_v36 = vld [vmem:[#allocation5 + $0x154] ss:$12 sps:$4 sm:$0xff]   ;;  %v3202_v38 = vld [vmem:[#allocation5 + $0x150] ss:$12 sps:$4 sm:$0xff]  }
  0x4f   : > { %v3200_v37 = vld [vmem:[#allocation5 + $0x2d4] ss:$12 sps:$4 sm:$0xff]   ;;  %v3203_v39 = vld [vmem:[#allocation5 + $0x2d0] ss:$12 sps:$4 sm:$0xff]   ;;  %v3208_v42 = vld [vmem:[#allocation5 + $0x138] ss:$12 sps:$4 sm:$0xff]  }
  0x50   : > { %1252 = vmatpush1.bf16.msra.mxu0 %v3166_v14  ;;  %v3204_v40 = vld [vmem:[#allocation5 + $0x13c] ss:$12 sps:$4 sm:$0xff]   ;;  %v3209_v43 = vld [vmem:[#allocation5 + $0x2b8] ss:$12 sps:$4 sm:$0xff]   ;;  %v211_v47 = vld [vmem:[%s3581_s24 + $0x30] sm:$0xff]  ;;  %s3062_s17 = smul.u32 768, %s3577_s6 }
  0x51   : > { %1445 = vmatpush1.bf16.msra.mxu1 %v3167_v15  ;;  %1253 = vmatprep.subr.bf16.mxu0 %v3168_v16  ;;  %v3206_v41 = vld [vmem:[#allocation5 + $0x2bc] ss:$12 sps:$4 sm:$0xff]   ;;  %v3210_v44 = vld [vmem:[#allocation5 + $0x124] ss:$12 sps:$4 sm:$0xff]   ;;  %v3214_v50 = vld [vmem:[#allocation5 + $0x120] ss:$12 sps:$4 sm:$0xff]  }
  0x52   : > { %1446 = vmatprep.subr.bf16.mxu1 %v3170_v17  ;;  %v3212_v45 = vld [vmem:[#allocation5 + $0x2a4] ss:$12 sps:$4 sm:$0xff]   ;;  %v206_v46 = vld [vmem:[%s3581_s24 + $0x8] sm:$0xff]  ;;  %v208_v48 = vld [vmem:[%s3581_s24 + $0x18] sm:$0xff]  ;;  %s4224_s19 = scalar_lea.vmem [#allocation7], %s3062_s17  ;;  %s3063_s21 = smul.u32 12288, %s3434_s12 }
  0x53   : > { %v213_v49 = vld [vmem:[%s3581_s24 + $0x40] sm:$0xff]  ;;  %v3216_v52 = vld [vmem:[#allocation5 + $0x10c] ss:$12 sps:$4 sm:$0xff]   ;;  %v3595_v53 = vpack.c.bf16 %v211_v47, %v206_v46  ;;  %v3220_v56 = vld [vmem:[#allocation5 + $0x108] ss:$12 sps:$4 sm:$0xff]   ;;  %s2516_s22 = sshll.u32 %s4224_s19, 4  ;;  %s4621_s22 = int_to_ptr.vmem [resolvable:$true] %s2516_s22 }
  0x54   : > { %1254 = vmatpush1.bf16.msra.mxu0 %v3172_v18  ;;  %v3215_v51 = vld [vmem:[#allocation5 + $0x2a0] ss:$12 sps:$4 sm:$0xff]   ;;  %v3597_v54 = vpack.c.bf16 %v213_v49, %v208_v48  ;;  %v3221_v57 = vld [vmem:[#allocation5 + $0x288] ss:$12 sps:$4 sm:$0xff]   ;;  %v3226_v60 = vld [vmem:[#allocation5 + $0xf0] ss:$12 sps:$4 sm:$0xff]   ;;  %s4619_s26 = scalar_lea.hbm %s4671_s2, %s3063_s21 }
  0x55   : > { %1447 = vmatpush1.bf16.msra.mxu1 %v3173_v19  ;;  %1255 = vmatprep.subr.bf16.mxu0 %v3174_v20  ;;  %v3218_v55 = vld [vmem:[#allocation5 + $0x28c] ss:$12 sps:$4 sm:$0xff]   ;;  %v3222_v58 = vld [vmem:[#allocation5 + $0xf4] ss:$12 sps:$4 sm:$0xff]   ;;  %v3227_v61 = vld [vmem:[#allocation5 + $0x270] ss:$12 sps:$4 sm:$0xff]  }
  0x56   : > { %1448 = vmatprep.subr.bf16.mxu1 %v3176_v21  ;;  %1277 = vmatprep.mubr.bf16.mxu0 %v3595_v53  ;;  %v3224_v59 = vld [vmem:[#allocation5 + $0x274] ss:$12 sps:$4 sm:$0xff]   ;;  %v3228_v62 = vld [vmem:[#allocation5 + $0xdc] ss:$12 sps:$4 sm:$0xff]   ;;  %v3232_v0 = vld [vmem:[#allocation5 + $0xd8] ss:$12 sps:$4 sm:$0xff]  }
  0x57   : > { %1470 = vmatprep.mubr.bf16.mxu1 %v3597_v54  ;;  %v3230_v63 = vld [vmem:[#allocation5 + $0x25c] ss:$12 sps:$4 sm:$0xff]   ;;  %v3233_v1 = vld [vmem:[#allocation5 + $0x258] ss:$12 sps:$4 sm:$0xff]   ;;  %v3238_v4 = vld [vmem:[#allocation5 + $0xc0] ss:$12 sps:$4 sm:$0xff]  }
  0x58   : > { %1256 = vmatpush1.bf16.msra.mxu0 %v3178_v22  ;;  %v3234_v2 = vld [vmem:[#allocation5 + $0xc4] ss:$12 sps:$4 sm:$0xff]   ;;  %v3239_v5 = vld [vmem:[#allocation5 + $0x240] ss:$12 sps:$4 sm:$0xff]   ;;  %v212_v9 = vld [vmem:[%s3581_s24 + $0x38] sm:$0xff]  ;;  %s2500_s12 = scalar_lea.sflag [#allocation4], %s3577_s6 }
  0x59   : > { %1449 = vmatpush1.bf16.msra.mxu1 %v3179_v23  ;;  %1257 = vmatprep.subr.bf16.mxu0 %v3180_v24  ;;  %v3236_v3 = vld [vmem:[#allocation5 + $0x244] ss:$12 sps:$4 sm:$0xff]   ;;  %v210_v7 = vld [vmem:[%s3581_s24 + $0x28] sm:$0xff]  ;;  %v216_v11 = vld [vmem:[%s3581_s24 + $0x58] sm:$0xff]  ;;  %s3358_s27 = scalar_lea.vmem %s4621_s22, 12288  ;;  %s3451_s28 = smov [#allocation7]  }
  0x5a   : > { %1450 = vmatprep.subr.bf16.mxu1 %v3182_v25  ;;  %v205_v6 = vld [vmem:[%s3581_s24] sm:$0xff]  ;;  %v207_v8 = vld [vmem:[%s3581_s24 + $0x10] sm:$0xff]  ;;  %v3242_v10 = vld [vmem:[#allocation5 + $0x3ac] ss:$12 sps:$4 sm:$0xff]   ;;  %p3359_p1 = scmp.ne.s32.totalorder %s4621_s22, %s3358_s27  ;;  %s3362_s29 = sshll.u32 %s3451_s28, 4  ;;  %s3363_s29 = int_to_ptr.vmem [resolvable:$false] %s3362_s29 }
  0x5b   : > { %v221_v12 = vld [vmem:[%s3581_s24 + $0x80] sm:$0xff]  ;;  %v218_v13 = vld [vmem:[%s3581_s24 + $0x68] sm:$0xff]  ;;  %v223_v14 = vld [vmem:[%s3581_s24 + $0x90] sm:$0xff]  ;;  %v3609_v15 = vpack.c.bf16 %v210_v7, %v205_v6  ;;  %v3611_v16 = vpack.c.bf16 %v212_v9, %v207_v8  ;;  %s3364_s30 = scalar_lea.vmem %s3363_s29, 24576  ;;  %p3365_p3 = scmp.lt.s32.totalorder %s4621_s22, %s3363_s29 }
  0x5c   : > { %1258 = vmatpush1.bf16.msra.mxu0 %v3184_v26  ;;  %v3240_v17 = vld [vmem:[#allocation5 + $0x3a8] ss:$12 sps:$4 sm:$0xff]   ;;  %v3613_v18 = vpack.c.bf16 %v221_v12, %v216_v11  ;;  %v3615_v19 = vpack.c.bf16 %v223_v14, %v218_v13  ;;  %v220_v22 = vld [vmem:[%s3581_s24 + $0x78] sm:$0xff]  ;;  %v217_v23 = vld [vmem:[%s3581_s24 + $0x60] sm:$0xff]  ;;  %p3360_p4 = pnand %p3359_p1, %p3551_p13  ;;  %p3366_p10 = scmp.lt.s32.totalorder %s3364_s30, %s3358_s27 }
  0x5d   : > { %1451 = vmatpush1.bf16.msra.mxu1 %v3185_v27  ;;  %1259 = vmatprep.subr.bf16.mxu0 %v3186_v28  ;;  %v215_v20 = vld [vmem:[%s3581_s24 + $0x50] sm:$0xff]  ;;  %v222_v24 = vld [vmem:[%s3581_s24 + $0x88] sm:$0xff]  ;;  %v228_v28 = vld [vmem:[%s3581_s24 + $0xb8] sm:$0xff] }
  0x5e   : > { %1452 = vmatprep.subr.bf16.mxu1 %v3188_v29  ;;  %v3245_v21 = vld [vmem:[#allocation5 + $0x394] ss:$12 sps:$4 sm:$0xff]   ;;  %v226_v25 = vld [vmem:[%s3581_s24 + $0xa8] sm:$0xff]  ;;  %v3243_v27 = vld [vmem:[#allocation5 + $0x390] ss:$12 sps:$4 sm:$0xff]   ;;  %p3361_p8 = pneg %p3360_p4  ;;  %p3367_p2 = por %p3366_p10, %p3365_p3 }
  0x5f   : > { %v231_v26 = vld [vmem:[%s3581_s24 + $0xd0] sm:$0xff]  ;;  %v233_v29 = vld [vmem:[%s3581_s24 + $0xe0] sm:$0xff]  ;;  %v3254_v46 = vld [vmem:[#allocation5 + $0x34c] ss:$12 sps:$4 sm:$0xff]  }
  0x60   : > { %1260 = vmatpush1.bf16.msra.mxu0 %v3190_v30  ;;  %v3248_v30 = vld [vmem:[#allocation5 + $0x37c] ss:$12 sps:$4 sm:$0xff]   ;;  %v245_v6 = vld [vmem:[%s3581_s24 + $0x140] sm:$0xff]  ;;  %v247_v8 = vld [vmem:[%s3581_s24 + $0x150] sm:$0xff]  ;;  %p3368_p5 = pnand %p3367_p2, %p3361_p8 }
  0x61   : > { %1453 = vmatpush1.bf16.msra.mxu1 %v3191_v31  ;;  %1261 = vmatprep.subr.bf16.mxu0 %v3192_v32  ;;  %v3629_v31 = vpack.c.bf16 %v220_v22, %v215_v20  ;;  %v3631_v32 = vpack.c.bf16 %v222_v24, %v217_v23  ;;  %v250_v7 = vld [vmem:[%s3581_s24 + $0x168] sm:$0xff]  ;;  %v252_v9 = vld [vmem:[%s3581_s24 + $0x178] sm:$0xff]  ;;  %v261_v11 = vld [vmem:[%s3581_s24 + $0x1c0] sm:$0xff] }
  0x62   : > { %1454 = vmatprep.subr.bf16.mxu1 %v3194_v33  ;;  %v3633_v33 = vpack.c.bf16 %v231_v26, %v226_v25  ;;  %v258_v12 = vld [vmem:[%s3581_s24 + $0x1a8] sm:$0xff]  ;;  %v263_v13 = vld [vmem:[%s3581_s24 + $0x1d0] sm:$0xff]  ;;  %v3689_v20 = vpack.c.bf16 %v250_v7, %v245_v6  ;;  %v260_v25 = vld [vmem:[%s3581_s24 + $0x1b8] sm:$0xff] }
  0x63   : > { %v3261_v14 = vld [vmem:[#allocation5 + $0x300] ss:$12 sps:$4 sm:$0xff]   ;;  %v3695_v23 = vpack.c.bf16 %v263_v13, %v258_v12  ;;  %v255_v24 = vld [vmem:[%s3581_s24 + $0x190] sm:$0xff]  ;;  %v288_v6 = vld [vmem:[%s3581_s24 + $0x298] sm:$0xff] }
  0x64   : > { %1262 = vmatpush2.bf16.msra.mxu0 %v3196_v34  ;;  %v3635_v34 = vpack.c.bf16 %v233_v29, %v228_v28  ;;  %v257_v26 = vld [vmem:[%s3581_s24 + $0x1a0] sm:$0xff]  ;;  %v3264_v28 = vld [vmem:[#allocation5 + $0x170] ss:$12 sps:$4 sm:$0xff]   ;;  %v266_v29 = vld [vmem:[%s3581_s24 + $0x1e8] sm:$0xff] }
  0x65   : > { %1455 = vmatpush2.bf16.msra.mxu1 %v3197_v35  ;;  %1263 = vmatprep.subr.bf16.mxu0 %v3198_v36  ;;  %v3246_v35 = vld [vmem:[#allocation5 + $0x378] ss:$12 sps:$4 sm:$0xff]   ;;  %v290_v13 = vld [vmem:[%s3581_s24 + $0x2a8] sm:$0xff] }
  0x66   : > { %1456 = vmatprep.subr.bf16.mxu1 %v3200_v37  ;;  %v3251_v36 = vld [vmem:[#allocation5 + $0x364] ss:$12 sps:$4 sm:$0xff]  }
  0x67   : > { %v225_v37 = vld [vmem:[%s3581_s24 + $0xa0] sm:$0xff] }
  0x68   : > { %1264 = vmatpush2.bf16.msra.mxu0 %v3202_v38  ;;  %v230_v38 = vld [vmem:[%s3581_s24 + $0xc8] sm:$0xff]  ;;  %v293_v7 = vld [vmem:[%s3581_s24 + $0x2c0] sm:$0xff] }
  0x69   : > { %1457 = vmatpush2.bf16.msra.mxu1 %v3203_v39  ;;  %1265 = vmatprep.subr.bf16.mxu0 %v3204_v40  ;;  %v227_v39 = vld [vmem:[%s3581_s24 + $0xb0] sm:$0xff]  ;;  %v232_v40 = vld [vmem:[%s3581_s24 + $0xd8] sm:$0xff]  ;;  %v3649_v47 = vpack.c.bf16 %v230_v38, %v225_v37  ;;  %v273_v37 = vld [vmem:[%s3581_s24 + $0x220] sm:$0xff]  ;;  %v3709_v38 = vpack.c.bf16 %v260_v25, %v255_v24 }
  0x6a   : > { %1458 = vmatprep.subr.bf16.mxu1 %v3206_v41  ;;  %v236_v41 = vld [vmem:[%s3581_s24 + $0xf8] sm:$0xff]  ;;  %v3651_v48 = vpack.c.bf16 %v232_v40, %v227_v39  ;;  %v285_v12 = vld [vmem:[%s3581_s24 + $0x280] sm:$0xff] }
  0x6b   : > { %v296_v24 = vld [vmem:[%s3581_s24 + $0x2d8] sm:$0xff]  ;;  %v301_v25 = vld [vmem:[%s3581_s24 + $0x300] sm:$0xff] }
  0x6c   : > { %1266 = vmatpush2.bf16.msra.mxu0 %v3208_v42  ;;  %v241_v42 = vld [vmem:[%s3581_s24 + $0x120] sm:$0xff] }
  0x6d   : > { %1459 = vmatpush2.bf16.msra.mxu1 %v3209_v43  ;;  %1267 = vmatprep.subr.bf16.mxu0 %v3210_v44  ;;  %v238_v43 = vld [vmem:[%s3581_s24 + $0x108] sm:$0xff]  ;;  %v243_v44 = vld [vmem:[%s3581_s24 + $0x130] sm:$0xff]  ;;  %v3653_v49 = vpack.c.bf16 %v241_v42, %v236_v41  ;;  %v265_v42 = vld [vmem:[%s3581_s24 + $0x1e0] sm:$0xff] }
  0x6e   : > { %1460 = vmatprep.subr.bf16.mxu1 %v3212_v45  ;;  %v3249_v45 = vld [vmem:[#allocation5 + $0x360] ss:$12 sps:$4 sm:$0xff]  }
  0x70   : > { %1268 = vmatpush2.bf16.msra.mxu0 %v3214_v50  ;;  %v3655_v50 = vpack.c.bf16 %v243_v44, %v238_v43  ;;  %v270_v43 = vld [vmem:[%s3581_s24 + $0x208] sm:$0xff]  ;;  %v267_v44 = vld [vmem:[%s3581_s24 + $0x1f0] sm:$0xff] }
  0x71   : > { %1461 = vmatpush2.bf16.msra.mxu1 %v3215_v51  ;;  %1269 = vmatprep.subr.bf16.mxu0 %v3216_v52  ;;  %v3252_v51 = vld [vmem:[#allocation5 + $0x348] ss:$12 sps:$4 sm:$0xff]  }
  0x72   : > { %1462 = vmatprep.subr.bf16.mxu1 %v3218_v55  ;;  %v235_v52 = vld [vmem:[%s3581_s24 + $0xf0] sm:$0xff]  ;;  %v240_v55 = vld [vmem:[%s3581_s24 + $0x118] sm:$0xff] }
  0x74   : > { %1270 = vmatpush2.bf16.msra.mxu0 %v3220_v56  ;;  %v3257_v56 = vld [vmem:[#allocation5 + $0x334] ss:$12 sps:$4 sm:$0xff]  }
  0x75   : > { %1463 = vmatpush2.bf16.msra.mxu1 %v3221_v57  ;;  %1271 = vmatprep.subr.bf16.mxu0 %v3222_v58  ;;  %v237_v57 = vld [vmem:[%s3581_s24 + $0x100] sm:$0xff]  ;;  %v242_v58 = vld [vmem:[%s3581_s24 + $0x128] sm:$0xff] }
  0x76   : > { %1464 = vmatprep.subr.bf16.mxu1 %v3224_v59  ;;  %v246_v59 = vld [vmem:[%s3581_s24 + $0x148] sm:$0xff] }
  0x78   : > { %1272 = vmatpush2.bf16.msra.mxu0 %v3226_v60  ;;  %v251_v60 = vld [vmem:[%s3581_s24 + $0x170] sm:$0xff] }
  0x79   : > { %1465 = vmatpush2.bf16.msra.mxu1 %v3227_v61  ;;  %1273 = vmatprep.subr.bf16.mxu0 %v3228_v62  ;;  %v248_v61 = vld [vmem:[%s3581_s24 + $0x158] sm:$0xff]  ;;  %v253_v62 = vld [vmem:[%s3581_s24 + $0x180] sm:$0xff] }
  0x7a   : > { %1466 = vmatprep.subr.bf16.mxu1 %v3230_v63  ;;  %v3255_v63 = vld [vmem:[#allocation5 + $0x330] ss:$12 sps:$4 sm:$0xff]  }
  0x7c   : > { %1274 = vmatpush2.bf16.msra.mxu0 %v3232_v0  ;;  %v3260_v0 = vld [vmem:[#allocation5 + $0x31c] ss:$12 sps:$4 sm:$0xff]  }
  0x7d   : > { %1467 = vmatpush2.bf16.msra.mxu1 %v3233_v1  ;;  %1275 = vmatprep.subr.bf16.mxu0 %v3234_v2  ;;  %v3669_v1 = vpack.c.bf16 %v240_v55, %v235_v52  ;;  %v3671_v2 = vpack.c.bf16 %v242_v58, %v237_v57  ;;  %v278_v52 = vld [vmem:[%s3581_s24 + $0x248] sm:$0xff]  ;;  %v283_v55 = vld [vmem:[%s3581_s24 + $0x270] sm:$0xff] }
  0x7e   : > { %1468 = vmatprep.subr.bf16.mxu1 %v3236_v3  ;;  %v3673_v3 = vpack.c.bf16 %v251_v60, %v246_v59  ;;  %v3735_v59 = vpack.c.bf16 %v283_v55, %v278_v52  ;;  %v275_v60 = vld [vmem:[%s3581_s24 + $0x230] sm:$0xff] }
  0x80   : > { %1276 = vmatpush2.bf16.msra.mxu0 %v3238_v4  ;;  %v3675_v4 = vpack.c.bf16 %v253_v62, %v248_v61  ;;  %v280_v61 = vld [vmem:[%s3581_s24 + $0x258] sm:$0xff]  ;;  %v277_v62 = vld [vmem:[%s3581_s24 + $0x240] sm:$0xff] }
  0x81   : > { %1469 = vmatpush2.bf16.msra.mxu1 %v3239_v5  ;;  %1631 = vmatprep.subr.bf16.mxu0 %v3242_v10  ;;  %v3258_v5 = vld [vmem:[#allocation5 + $0x318] ss:$12 sps:$4 sm:$0xff]  }
  0x82   : > { %3043 = vmatprep.subr.bf16.mxu1 %v3242_v10  ;;  %v256_v10 = vld [vmem:[%s3581_s24 + $0x198] sm:$0xff] }
  0x83   : > { %1278 = vmatmul.mubr.bf16.vlgmr.msra.gmra.mxu0 %v3609_v15  ;;  %v3693_v22 = vpack.c.bf16 %v261_v11, %v256_v10  ;;  %v3755_v11 = vpack.c.bf16 %v293_v7, %v288_v6  ;;  %v316_v6 = vld [vmem:[%s3581_s24 + $0x378] sm:$0xff]  ;;  %v321_v7 = vld [vmem:[%s3581_s24 + $0x3a0] sm:$0xff] }
  0x84   : > { %1471 = vmatmul.mubr.bf16.vlgmr.msra.gmra.mxu1 %v3611_v16  ;;  %1632 = vmatpush1.bf16.msra.mxu0 %v3240_v17 }
  0x85   : > { %3051 = vmatpush1.bf16.msra.mxu1 %v3240_v17  ;;  %1287 = vmatprep.mubr.bf16.mxu0 %v3613_v18  ;;  %v3263_v17 = vld [vmem:[#allocation5 + $0x304] ss:$12 sps:$4 sm:$0xff]   ;;  %4706 = vst [vmem:[#allocation12_spill] sm:$0xff] %v3755_v11 }
  0x86   : > { %1480 = vmatprep.mubr.bf16.mxu1 %v3615_v19  ;;  %1633 = vmatprep.subr.bf16.mxu0 %v3245_v21 }
  0x87   : > { %3044 = vmatprep.subr.bf16.mxu1 %v3245_v21  ;;  %v3691_v21 = vpack.c.bf16 %v252_v9, %v247_v8  ;;  %v3749_v8 = vpack.c.bf16 %v280_v61, %v275_v60 }
  0x88   : > { %1634 = vmatpush1.bf16.msra.mxu0 %v3243_v27 }
  0x89   : > { %3052 = vmatpush1.bf16.msra.mxu1 %v3243_v27  ;;  %1635 = vmatprep.subr.bf16.mxu0 %v3248_v30  ;;  %v262_v27 = vld [vmem:[%s3581_s24 + $0x1c8] sm:$0xff] }
  0x8a   : > { %3045 = vmatprep.subr.bf16.mxu1 %v3248_v30  ;;  %v271_v30 = vld [vmem:[%s3581_s24 + $0x210] sm:$0xff]  ;;  %v3711_v39 = vpack.c.bf16 %v262_v27, %v257_v26  ;;  %v298_v26 = vld [vmem:[%s3581_s24 + $0x2e8] sm:$0xff] }
  0x8b   : > { %1288 = vmatmul.mubr.bf16.gmra.mxu0 %v3629_v31  ;;  %v3713_v40 = vpack.c.bf16 %v271_v30, %v266_v29  ;;  %v303_v27 = vld [vmem:[%s3581_s24 + $0x310] sm:$0xff]  ;;  %v3773_v30 = vpack.c.bf16 %v301_v25, %v296_v24  ;;  %v3813_v24 = vpack.c.bf16 %v321_v7, %v316_v6  ;;  %v332_v7 = vld [vmem:[%s3581_s24 + $0x3f8] sm:$0xff] }
  0x8c   : > { %1481 = vmatmul.mubr.bf16.gmra.mxu1 %v3631_v32  ;;  %1297 = vmatprep.mubr.bf16.mxu0 %v3633_v33  ;;  %v327_v6 = vld [vmem:[%s3581_s24 + $0x3d0] sm:$0xff] }
  0x8d   : > { %1490 = vmatprep.mubr.bf16.mxu1 %v3635_v34  ;;  %1636 = vmatpush1.bf16.msra.mxu0 %v3246_v35 }
  0x8e   : > { %3053 = vmatpush1.bf16.msra.mxu1 %v3246_v35  ;;  %1637 = vmatprep.subr.bf16.mxu0 %v3251_v36  ;;  %v3265_v35 = vld [vmem:[#allocation5 + $0x2f0] ss:$12 sps:$4 sm:$0xff]  }
  0x8f   : > { %3046 = vmatprep.subr.bf16.mxu1 %v3251_v36  ;;  %v268_v36 = vld [vmem:[%s3581_s24 + $0x1f8] sm:$0xff] }
  0x90   : > { %v3715_v41 = vpack.c.bf16 %v273_v37, %v268_v36  ;;  %v295_v36 = vld [vmem:[%s3581_s24 + $0x2d0] sm:$0xff]  ;;  %v300_v37 = vld [vmem:[%s3581_s24 + $0x2f8] sm:$0xff] }
  0x91   : > { %1638 = vmatpush1.bf16.msra.mxu0 %v3249_v45  ;;  %v3789_v52 = vpack.c.bf16 %v300_v37, %v295_v36  ;;  %v317_v36 = vld [vmem:[%s3581_s24 + $0x380] sm:$0xff]  ;;  %v322_v37 = vld [vmem:[%s3581_s24 + $0x3a8] sm:$0xff] }
  0x92   : > { %3054 = vmatpush1.bf16.msra.mxu1 %v3249_v45  ;;  %1639 = vmatprep.subr.bf16.mxu0 %v3254_v46  ;;  %v272_v45 = vld [vmem:[%s3581_s24 + $0x218] sm:$0xff] }
  0x93   : > { %3047 = vmatprep.subr.bf16.mxu1 %v3254_v46  ;;  %1298 = vmatmul.mubr.bf16.gmra.mxu0 %v3649_v47  ;;  %v276_v46 = vld [vmem:[%s3581_s24 + $0x238] sm:$0xff]  ;;  %v3731_v57 = vpack.c.bf16 %v272_v45, %v267_v44  ;;  %v306_v44 = vld [vmem:[%s3581_s24 + $0x328] sm:$0xff]  ;;  %v311_v45 = vld [vmem:[%s3581_s24 + $0x350] sm:$0xff] }
  0x94   : > { %1491 = vmatmul.mubr.bf16.gmra.mxu1 %v3651_v48  ;;  %1307 = vmatprep.mubr.bf16.mxu0 %v3653_v49  ;;  %v3793_v60 = vpack.c.bf16 %v311_v45, %v306_v44  ;;  %v328_v44 = vld [vmem:[%s3581_s24 + $0x3d8] sm:$0xff]  ;;  %v333_v45 = vld [vmem:[%s3581_s24 + $0x400] sm:$0xff] }
  0x95   : > { %1500 = vmatprep.mubr.bf16.mxu1 %v3655_v50  ;;  %1640 = vmatpush1.bf16.msra.mxu0 %v3252_v51 }
  0x96   : > { %3055 = vmatpush1.bf16.msra.mxu1 %v3252_v51  ;;  %1641 = vmatprep.subr.bf16.mxu0 %v3257_v56  ;;  %v281_v51 = vld [vmem:[%s3581_s24 + $0x260] sm:$0xff] }
  0x97   : > { %3048 = vmatprep.subr.bf16.mxu1 %v3257_v56  ;;  %v3729_v56 = vpack.c.bf16 %v270_v43, %v265_v42  ;;  %v3733_v58 = vpack.c.bf16 %v281_v51, %v276_v46  ;;  %v297_v42 = vld [vmem:[%s3581_s24 + $0x2e0] sm:$0xff]  ;;  %v302_v43 = vld [vmem:[%s3581_s24 + $0x308] sm:$0xff]  ;;  %v308_v46 = vld [vmem:[%s3581_s24 + $0x338] sm:$0xff] }
  0x98   : > { %v313_v51 = vld [vmem:[%s3581_s24 + $0x360] sm:$0xff]  ;;  %v3791_v55 = vpack.c.bf16 %v302_v43, %v297_v42  ;;  %v326_v42 = vld [vmem:[%s3581_s24 + $0x3c8] sm:$0xff]  ;;  %v331_v43 = vld [vmem:[%s3581_s24 + $0x3f0] sm:$0xff] }
  0x99   : > { %1642 = vmatpush1.bf16.msra.mxu0 %v3255_v63  ;;  %v3795_v61 = vpack.c.bf16 %v313_v51, %v308_v46  ;;  %v3831_v51 = vpack.c.bf16 %v322_v37, %v317_v36  ;;  %v3851_v37 = vpack.c.bf16 %v332_v7, %v327_v6  ;;  %v346_v6 = vld [vmem:[%s3581_s24 + $0x468] sm:$0xff]  ;;  %v351_v7 = vld [vmem:[%s3581_s24 + $0x490] sm:$0xff] }
  0x9a   : > { %3056 = vmatpush1.bf16.msra.mxu1 %v3255_v63  ;;  %1643 = vmatprep.subr.bf16.mxu0 %v3260_v0  ;;  %v282_v63 = vld [vmem:[%s3581_s24 + $0x268] sm:$0xff]  ;;  %4709 = vst [vmem:[#allocation15_spill] sm:$0xff] %v3791_v55 }
  0x9b   : > { %3049 = vmatprep.subr.bf16.mxu1 %v3260_v0  ;;  %1308 = vmatmul.mubr.bf16.gmra.mxu0 %v3669_v1  ;;  %v286_v0 = vld [vmem:[%s3581_s24 + $0x288] sm:$0xff]  ;;  %v3751_v9 = vpack.c.bf16 %v282_v63, %v277_v62  ;;  %4710 = vst [vmem:[#allocation16_spill] sm:$0xff] %v3795_v61  ;;  %v305_v62 = vld [vmem:[%s3581_s24 + $0x320] sm:$0xff]  ;;  %4713 = vst [vmem:[#allocation19_spill] sm:$0xff] %v3831_v51 }
  0x9c   : > { %1501 = vmatmul.mubr.bf16.gmra.mxu1 %v3671_v2  ;;  %1317 = vmatprep.mubr.bf16.mxu0 %v3673_v3  ;;  %v310_v63 = vld [vmem:[%s3581_s24 + $0x348] sm:$0xff]  ;;  %4715 = vst [vmem:[#allocation21_spill] sm:$0xff] %v3851_v37 }
  0x9d   : > { %1510 = vmatprep.mubr.bf16.mxu1 %v3675_v4  ;;  %1644 = vmatpush1.bf16.msra.mxu0 %v3258_v5  ;;  %4705 = vst [vmem:[#allocation11_spill] sm:$0xff] %v3751_v9 }
  0x9e   : > { %3057 = vmatpush1.bf16.msra.mxu1 %v3258_v5  ;;  %1645 = vmatprep.subr.bf16.mxu0 %v3263_v17  ;;  %v291_v5 = vld [vmem:[%s3581_s24 + $0x2b0] sm:$0xff] }
  0x9f   : > { %3050 = vmatprep.subr.bf16.mxu1 %v3263_v17  ;;  %v3753_v10 = vpack.c.bf16 %v291_v5, %v286_v0  ;;  %v292_v17 = vld [vmem:[%s3581_s24 + $0x2b8] sm:$0xff]  ;;  %v307_v0 = vld [vmem:[%s3581_s24 + $0x330] sm:$0xff] }
  0xa0   : > { %v312_v5 = vld [vmem:[%s3581_s24 + $0x358] sm:$0xff] }
  0xa1   : > { %1646 = vmatpush1.bf16.msra.mxu0 %v3261_v14 }
  0xa2   : > { %3058 = vmatpush1.bf16.msra.mxu1 %v3261_v14  ;;  %2859 = vmatprep.subr.bf16.mxu0 %v3265_v35  ;;  %v287_v14 = vld [vmem:[%s3581_s24 + $0x290] sm:$0xff]  ;;  %v3775_v35 = vpack.c.bf16 %v303_v27, %v298_v26  ;;  %v320_v27 = vld [vmem:[%s3581_s24 + $0x398] sm:$0xff] }
  0xa3   : > { %1318 = vmatmul.mubr.bf16.gmra.mxu0 %v3689_v20  ;;  %2747 = vmatprep.subr.bf16.mxu1 %v3264_v28  ;;  %v3769_v28 = vpack.c.bf16 %v290_v13, %v285_v12  ;;  %v3771_v29 = vpack.c.bf16 %v292_v17, %v287_v14  ;;  %v318_v12 = vld [vmem:[%s3581_s24 + $0x388] sm:$0xff]  ;;  %v323_v13 = vld [vmem:[%s3581_s24 + $0x3b0] sm:$0xff]  ;;  %v3809_v14 = vpack.c.bf16 %v310_v63, %v305_v62 }
  0xa4   : > { %1511 = vmatmul.mubr.bf16.gmra.mxu1 %v3691_v21  ;;  %1327 = vmatprep.mubr.bf16.mxu0 %v3693_v22  ;;  %4708 = vst [vmem:[#allocation14_spill] sm:$0xff] %v3775_v35  ;;  %v3811_v17 = vpack.c.bf16 %v312_v5, %v307_v0  ;;  %v3815_v25 = vpack.c.bf16 %v323_v13, %v318_v12  ;;  %v315_v26 = vld [vmem:[%s3581_s24 + $0x370] sm:$0xff]  ;;  %v325_v0 = vld [vmem:[%s3581_s24 + $0x3c0] sm:$0xff]  ;;  %v330_v5 = vld [vmem:[%s3581_s24 + $0x3e8] sm:$0xff] }
  0xa5   : > { %1520 = vmatprep.mubr.bf16.mxu1 %v3695_v23  ;;  %4707 = vst [vmem:[#allocation13_spill] sm:$0xff] %v3771_v29  ;;  %v3829_v46 = vpack.c.bf16 %v320_v27, %v315_v26  ;;  %v3833_v62 = vpack.c.bf16 %v331_v43, %v326_v42  ;;  %v3835_v63 = vpack.c.bf16 %v333_v45, %v328_v44  ;;  %v336_v12 = vld [vmem:[%s3581_s24 + $0x418] sm:$0xff]  ;;  %v341_v13 = vld [vmem:[%s3581_s24 + $0x440] sm:$0xff]  ;;  %v338_v26 = vld [vmem:[%s3581_s24 + $0x428] sm:$0xff] }
  0xa6   : > { %4711 = vst [vmem:[#allocation17_spill] sm:$0xff] %v3811_v17  ;;  %4712 = vst [vmem:[#allocation18_spill] sm:$0xff] %v3815_v25  ;;  %v343_v27 = vld [vmem:[%s3581_s24 + $0x450] sm:$0xff]  ;;  %v3849_v36 = vpack.c.bf16 %v330_v5, %v325_v0  ;;  %v3853_v42 = vpack.c.bf16 %v341_v13, %v336_v12  ;;  %v340_v45 = vld [vmem:[%s3581_s24 + $0x438] sm:$0xff] }
  0xa7   : > { %4714 = vst [vmem:[#allocation20_spill] sm:$0xff] %v3835_v63  ;;  %v3855_v43 = vpack.c.bf16 %v343_v27, %v338_v26  ;;  %v335_v44 = vld [vmem:[%s3581_s24 + $0x410] sm:$0xff]  ;;  %v337_v0 = vld [vmem:[%s3581_s24 + $0x420] sm:$0xff]  ;;  %v342_v5 = vld [vmem:[%s3581_s24 + $0x448] sm:$0xff] }
  0xa8   : > { %v348_v12 = vld [vmem:[%s3581_s24 + $0x478] sm:$0xff]  ;;  %v353_v13 = vld [vmem:[%s3581_s24 + $0x4a0] sm:$0xff]  ;;  %v3869_v26 = vpack.c.bf16 %v340_v45, %v335_v44  ;;  %v3871_v27 = vpack.c.bf16 %v342_v5, %v337_v0  ;;  %v347_v44 = vld [vmem:[%s3581_s24 + $0x470] sm:$0xff] }
  0xa9   : > { %4716 = vst [vmem:[#allocation22_spill] sm:$0xff] %v3855_v43  ;;  %v352_v45 = vld [vmem:[%s3581_s24 + $0x498] sm:$0xff]  ;;  %v361_v5 = vld [vmem:[%s3581_s24 + $0x4e0] sm:$0xff] }
  0xaa   : > { %4717 = vst [vmem:[#allocation23_spill] sm:$0xff] %v3871_v27  ;;  %v356_v0 = vld [vmem:[%s3581_s24 + $0x4b8] sm:$0xff] }
  0xab   : > { %1328 = vmatmul.mubr.bf16.gmra.mxu0 %v3709_v38 }
  0xac   : > { %1521 = vmatmul.mubr.bf16.gmra.mxu1 %v3711_v39  ;;  %1337 = vmatprep.mubr.bf16.mxu0 %v3713_v40 }
  0xad   : > { %1530 = vmatprep.mubr.bf16.mxu1 %v3715_v41 }
  0xb3   : > { %1338 = vmatmul.mubr.bf16.gmra.mxu0 %v3729_v56 }
  0xb4   : > { %1531 = vmatmul.mubr.bf16.gmra.mxu1 %v3731_v57  ;;  %1347 = vmatprep.mubr.bf16.mxu0 %v3733_v58 }
  0xb5   : > { %1540 = vmatprep.mubr.bf16.mxu1 %v3735_v59 }
  0xbb   : > { %1348 = vmatmul.mubr.bf16.gmra.mxu0 %v3749_v8 }
  0xbc   : > { %1541 = vmatmul.mubr.bf16.gmra.mxu1 %v3751_v9  ;;  %1357 = vmatprep.mubr.bf16.mxu0 %v3753_v10  ;;  %v244_v9 = vld [vmem:[%s3581_s24 + $0x138] sm:$0xff] }
  0xbd   : > { %1550 = vmatprep.mubr.bf16.mxu1 %v3755_v11  ;;  %v3275_v11 = vld [vmem:[#allocation5 + $0x218] ss:$12 sps:$4 sm:$0xff]  }
  0xc3   : > { %1358 = vmatmul.mubr.bf16.gmra.mxu0 %v3769_v28 }
  0xc4   : > { %1551 = vmatmul.mubr.bf16.gmra.mxu1 %v3771_v29  ;;  %1367 = vmatprep.mubr.bf16.mxu0 %v3773_v30  ;;  %v344_v29 = vld [vmem:[%s3581_s24 + $0x458] sm:$0xff] }
  0xc5   : > { %1560 = vmatprep.mubr.bf16.mxu1 %v3775_v35  ;;  %v339_v35 = vld [vmem:[%s3581_s24 + $0x430] sm:$0xff] }
  0xcb   : > { %1368 = vmatmul.mubr.bf16.gmra.mxu0 %v3789_v52 }
  0xcc   : > { %1561 = vmatmul.mubr.bf16.gmra.mxu1 %v3791_v55  ;;  %1377 = vmatprep.mubr.bf16.mxu0 %v3793_v60  ;;  %v219_v55 = vld [vmem:[%s3581_s24 + $0x70] sm:$0xff] }
  0xcd   : > { %1570 = vmatprep.mubr.bf16.mxu1 %v3795_v61  ;;  %v3269_v61 = vld [vmem:[#allocation5 + $0x98] ss:$12 sps:$4 sm:$0xff]  }
  0xd3   : > { %1378 = vmatmul.mubr.bf16.gmra.mxu0 %v3809_v14 }
  0xd4   : > { %1571 = vmatmul.mubr.bf16.gmra.mxu1 %v3811_v17  ;;  %1387 = vmatprep.mubr.bf16.mxu0 %v3813_v24  ;;  %v3273_v17 = vld [vmem:[#allocation5 + $0x2d8] ss:$12 sps:$4 sm:$0xff]  }
  0xd5   : > { %1580 = vmatprep.mubr.bf16.mxu1 %v3815_v25 }
  0xdb   : > { %1388 = vmatmul.mubr.bf16.gmra.mxu0 %v3829_v46 }
  0xdc   : > { %1581 = vmatmul.mubr.bf16.gmra.mxu1 %v3831_v51  ;;  %1397 = vmatprep.mubr.bf16.mxu0 %v3833_v62  ;;  %v350_v51 = vld [vmem:[%s3581_s24 + $0x488] sm:$0xff] }
  0xdd   : > { %1590 = vmatprep.mubr.bf16.mxu1 %v3835_v63  ;;  %v3875_v63 = vpack.c.bf16 %v353_v13, %v348_v12  ;;  %v3891_v13 = vpack.c.bf16 %v352_v45, %v347_v44  ;;  %v362_v44 = vld [vmem:[%s3581_s24 + $0x4e8] sm:$0xff] }
  0xdf   : > { %4718 = vst [vmem:[#allocation24_spill] sm:$0xff] %v3875_v63  ;;  %4719 = vst [vmem:[#allocation25_spill] sm:$0xff] %v3891_v13 }
  0xe3   : > { %1398 = vmatmul.mubr.bf16.gmra.mxu0 %v3849_v36 }
  0xe4   : > { %1591 = vmatmul.mubr.bf16.gmra.mxu1 %v3851_v37  ;;  %1407 = vmatprep.mubr.bf16.mxu0 %v3853_v42  ;;  %v3873_v37 = vpack.c.bf16 %v351_v7, %v346_v6  ;;  %v358_v6 = vld [vmem:[%s3581_s24 + $0x4c8] sm:$0xff]  ;;  %v363_v7 = vld [vmem:[%s3581_s24 + $0x4f0] sm:$0xff] }
  0xe5   : > { %1600 = vmatprep.mubr.bf16.mxu1 %v3855_v43  ;;  %v345_v43 = vld [vmem:[%s3581_s24 + $0x460] sm:$0xff]  ;;  %v3895_v25 = vpack.c.bf16 %v363_v7, %v358_v6  ;;  %v4685_v6 = vmov 0   ;;  %v214_v7 = vld [vmem:[%s3581_s24 + $0x48] sm:$0xff] }
  0xe6   : > { %v3889_v12 = vpack.c.bf16 %v350_v51, %v345_v43  ;;  %v360_v51 = vld [vmem:[%s3581_s24 + $0x4d8] sm:$0xff]  ;;  %v357_v43 = vld [vmem:[%s3581_s24 + $0x4c0] sm:$0xff] }
  0xe7   : > { %4720 = vst [vmem:[#allocation26_spill] sm:$0xff] %v3895_v25 }
  0xeb   : > { %1408 = vmatmul.mubr.bf16.gmra.mxu0 %v3869_v26 }
  0xec   : > { %1601 = vmatmul.mubr.bf16.gmra.mxu1 %v3871_v27  ;;  %1417 = vmatprep.mubr.bf16.mxu0 %v3873_v37  ;;  %v3893_v27 = vpack.c.bf16 %v361_v5, %v356_v0  ;;  %v3907_v0 = vpack.c.bf16 %v362_v44, %v357_v43  ;;  %v209_v5 = vld [vmem:[%s3581_s24 + $0x20] sm:$0xff]  ;;  %v3266_v44 = vld [vmem:[#allocation5 + $0xb0] ss:$12 sps:$4 sm:$0xff]  }
  0xed   : > { %1610 = vmatprep.mubr.bf16.mxu1 %v3875_v63  ;;  %v355_v63 = vld [vmem:[%s3581_s24 + $0x4b0] sm:$0xff] }
  0xee   : > { %v3905_v45 = vpack.c.bf16 %v360_v51, %v355_v63  ;;  %4721 = vst [vmem:[#allocation27_spill] sm:$0xff] %v3907_v0  ;;  %v334_v63 = vld [vmem:[%s3581_s24 + $0x408] sm:$0xff]  ;;  %v3917_v51 = vpack.c.bf16 %v214_v7, %v209_v5  ;;  %v4724_v5 = vmov 0  }
  0xef   : > { %v3281_v7 = vld [vmem:[#allocation5 + $0x2c0] ss:$12 sps:$4 sm:$0xff]  }
  0xf0   : > { %4722 = vst [vmem:[#allocation28_spill] sm:$0xff] %v3917_v51 }
  0xf3   : > { %1418 = vmatmul.mubr.bf16.gmra.mxu0 %v3889_v12 }
  0xf4   : > { %1611 = vmatmul.mubr.bf16.gmra.mxu1 %v3891_v13  ;;  %1427 = vmatprep.mubr.bf16.mxu0 %v3893_v27  ;;  %v3267_v13 = vld [vmem:[#allocation5 + $0x230] ss:$12 sps:$4 sm:$0xff]  }
  0xf5   : > { %1620 = vmatprep.mubr.bf16.mxu1 %v3895_v25  ;;  %v329_v25 = vld [vmem:[%s3581_s24 + $0x3e0] sm:$0xff] }
  0xf6   : > { %v3919_v43 = vpack.c.bf16 %v334_v63, %v329_v25  ;;  %v3270_v25 = vld [vmem:[#allocation5 + $0x140] ss:$12 sps:$4 sm:$0xff]  }
  0xf8   : > { %4723 = vst [vmem:[#allocation29_spill] sm:$0xff] %v3919_v43 }
  0xfb   : > { %1428 = vmatmul.mubr.bf16.gmra.mxu0 %v3905_v45 }
  0xfc   : > { %1621 = vmatmul.mubr.bf16.gmra.mxu1 %v3907_v0  ;;  %1663 = vmatprep.mubr.bf16.mxu0 %v4685_v6  ;;  %v3268_v0 = vld [vmem:[#allocation5 + $0x158] ss:$12 sps:$4 sm:$0xff]  }
  0xfd   : > { %1783 = vmatprep.mubr.bf16.mxu1 %v4685_v6  ;;  %v224_v6 = vld [vmem:[%s3581_s24 + $0x98] sm:$0xff] }
  0xfe   : > { %v3929_v63 = vpack.c.bf16 %v224_v6, %v219_v55  ;;  %v3286_v55 = vld [vmem:[#allocation5 + $0x2a8] ss:$12 sps:$4 sm:$0xff]  }
  0xff   : > { %v3288_v6 = vld [vmem:[#allocation5 + $0x1e8] ss:$12 sps:$4 sm:$0xff]  }
 0x100   : > { %4725 = vst [vmem:[#allocation30_spill] sm:$0xff] %v3929_v63 }
 0x103   : > { %1664 = vmatmul.mubr.bf16.vlgmr.msra.gmra.mxu0 %v3917_v51  ;;  %v3274_v51 = vld [vmem:[#allocation5 + $0x68] ss:$12 sps:$4 sm:$0xff]  }
 0x104   : > { %1784 = vmatmul.mubr.bf16.vlgmr.msra.gmra.mxu1 %v3919_v43  ;;  %2860 = vmatpush3.bf16.msra.mxu0 %v3267_v13  ;;  %v3931_v43 = vpack.c.bf16 %v344_v29, %v339_v35  ;;  %v3271_v13 = vld [vmem:[#allocation5 + $0x80] ss:$12 sps:$4 sm:$0xff]  }
 0x105   : > { %2748 = vmatpush3.bf16.msra.mxu1 %v3266_v44  ;;  %1673 = vmatprep.mubr.bf16.mxu0 %v4724_v5  ;;  %v3283_v44 = vld [vmem:[#allocation5 + $0x200] ss:$12 sps:$4 sm:$0xff]  }
 0x106   : > { %2749 = vmatprep.subr.bf16.mxu1 %v3268_v0  ;;  %1793 = vmatprep.mubr.bf16.mxu1 %v4724_v5  ;;  %4726 = vst [vmem:[#allocation31_spill] sm:$0xff] %v3931_v43  ;;  %v3272_v0 = vld [vmem:[#allocation5 + $0x128] ss:$12 sps:$4 sm:$0xff]   ;;  %v349_v35 = vld [vmem:[%s3581_s24 + $0x480] sm:$0xff] }
 0x107   : > { %2861 = vmatprep.subr.bf16.mxu0 %v3273_v17  ;;  %v229_v17 = vld [vmem:[%s3581_s24 + $0xc0] sm:$0xff]  ;;  %v234_v29 = vld [vmem:[%s3581_s24 + $0xe8] sm:$0xff] }
 0x108   : > { %2862 = vmatpush3.bf16.msra.mxu0 %v3275_v11  ;;  %v3276_v11 = vld [vmem:[#allocation5 + $0x110] ss:$12 sps:$4 sm:$0xff]  }
 0x109   : > { %2750 = vmatpush3.bf16.msra.mxu1 %v3269_v61  ;;  %2863 = vmatprep.subr.bf16.mxu0 %v3281_v7  ;;  %v354_v61 = vld [vmem:[%s3581_s24 + $0x4a8] sm:$0xff] }
 0x10a   : > { %2751 = vmatprep.subr.bf16.mxu1 %v3270_v25  ;;  %v3941_v25 = vpack.c.bf16 %v234_v29, %v229_v17  ;;  %v3943_v7 = vpack.c.bf16 %v354_v61, %v349_v35  ;;  %v3290_v17 = vld [vmem:[#allocation5 + $0x1d0] ss:$12 sps:$4 sm:$0xff]   ;;  %v3292_v35 = vld [vmem:[#allocation5 + $0x278] ss:$12 sps:$4 sm:$0xff]  }
 0x10b   : > { %1674 = vmatmul.mubr.bf16.gmra.mxu0 %v3929_v63  ;;  %v3279_v63 = vld [vmem:[#allocation5 + $0x38] ss:$12 sps:$4 sm:$0xff]   ;;  %v359_v29 = vld [vmem:[%s3581_s24 + $0x4d0] sm:$0xff] }
 0x10c   : > { %1794 = vmatmul.mubr.bf16.gmra.mxu1 %v3931_v43  ;;  %1683 = vmatprep.mubr.bf16.mxu0 %v4724_v5  ;;  %4727 = vst [vmem:[#allocation32_spill] sm:$0xff] %v3943_v7  ;;  %v3278_v43 = vld [vmem:[#allocation5 + $0xf8] ss:$12 sps:$4 sm:$0xff]  }
 0x10d   : > { %2752 = vmatpush3.bf16.msra.mxu1 %v3271_v13  ;;  %1803 = vmatprep.mubr.bf16.mxu1 %v4724_v5  ;;  %v3277_v13 = vld [vmem:[#allocation5 + $0x50] ss:$12 sps:$4 sm:$0xff]  }
 0x10e   : > { %2753 = vmatprep.subr.bf16.mxu1 %v3272_v0  ;;  %2864 = vmatpush3.bf16.msra.mxu0 %v3283_v44  ;;  %v3289_v0 = vld [vmem:[#allocation5 + $0x290] ss:$12 sps:$4 sm:$0xff]  }
 0x10f   : > { %2865 = vmatprep.subr.bf16.mxu0 %v3286_v55  ;;  %v239_v44 = vld [vmem:[%s3581_s24 + $0x110] sm:$0xff]  ;;  %v364_v55 = vld [vmem:[%s3581_s24 + $0x4f8] sm:$0xff] }
 0x110   : > { %v3953_v61 = vpack.c.bf16 %v244_v9, %v239_v44  ;;  %v249_v9 = vld [vmem:[%s3581_s24 + $0x160] sm:$0xff]  ;;  %v254_v44 = vld [vmem:[%s3581_s24 + $0x188] sm:$0xff] }
 0x111   : > { %2754 = vmatpush3.bf16.msra.mxu1 %v3274_v51  ;;  %v3280_v51 = vld [vmem:[#allocation5 + $0xe0] ss:$12 sps:$4 sm:$0xff]  }
 0x112   : > { %2755 = vmatprep.subr.bf16.mxu1 %v3276_v11  ;;  %2866 = vmatpush3.bf16.msra.mxu0 %v3288_v6  ;;  %v3955_v11 = vpack.c.bf16 %v364_v55, %v359_v29  ;;  %v3282_v6 = vld [vmem:[#allocation5 + $0x20] ss:$12 sps:$4 sm:$0xff]   ;;  %v3963_v29 = vpack.c.bf16 %v254_v44, %v249_v9  ;;  %v3291_v55 = vld [vmem:[#allocation5 + $0x398] ss:$12 sps:$4 sm:$0xff]  }
 0x113   : > { %1684 = vmatmul.mubr.bf16.gmra.mxu0 %v3941_v25  ;;  %2867 = vmatprep.subr.bf16.mxu0 %v3289_v0  ;;  %v3285_v0 = vld [vmem:[#allocation5 + $0x8] ss:$12 sps:$4 sm:$0xff]   ;;  %v3301_v44 = vld [vmem:[#allocation5 + $0x338] ss:$12 sps:$4 sm:$0xff]  }
 0x114   : > { %1804 = vmatmul.mubr.bf16.gmra.mxu1 %v3943_v7  ;;  %1693 = vmatprep.mubr.bf16.mxu0 %v4724_v5  ;;  %4728 = vst [vmem:[#allocation33_spill] sm:$0xff] %v3955_v11  ;;  %v3293_v7 = vld [vmem:[#allocation5 + $0x1b8] ss:$12 sps:$4 sm:$0xff]  }
 0x115   : > { %2756 = vmatpush3.bf16.msra.mxu1 %v3277_v13  ;;  %1813 = vmatprep.mubr.bf16.mxu1 %v4724_v5  ;;  %v3284_v13 = vld [vmem:[#allocation5 + $0xc8] ss:$12 sps:$4 sm:$0xff]  }
 0x116   : > { %2757 = vmatprep.subr.bf16.mxu1 %v3278_v43  ;;  %2868 = vmatpush3.bf16.msra.mxu0 %v3290_v17  ;;  %v3295_v43 = vld [vmem:[#allocation5 + $0x260] ss:$12 sps:$4 sm:$0xff]  }
 0x117   : > { %2869 = vmatprep.subr.bf16.mxu0 %v3292_v35  ;;  %v3296_v17 = vld [vmem:[#allocation5 + $0x1a0] ss:$12 sps:$4 sm:$0xff]   ;;  %v3297_v35 = vld [vmem:[#allocation5 + $0x248] ss:$12 sps:$4 sm:$0xff]  }
 0x119   : > { %2758 = vmatpush3.bf16.msra.mxu1 %v3279_v63  ;;  %v3287_v63 = vld [vmem:[#allocation5 + $0x3b0] ss:$12 sps:$4 sm:$0xff]  }
 0x11a   : > { %2759 = vmatprep.subr.bf16.mxu1 %v3280_v51  ;;  %2870 = vmatpush3.bf16.msra.mxu0 %v3293_v7  ;;  %v3299_v51 = vld [vmem:[#allocation5 + $0x188] ss:$12 sps:$4 sm:$0xff]   ;;  %v264_v7 = vld [vmem:[%s3581_s24 + $0x1d8] sm:$0xff] }
 0x11b   : > { %1694 = vmatmul.mubr.bf16.gmra.mxu0 %v3953_v61  ;;  %2871 = vmatprep.subr.bf16.mxu0 %v3295_v43  ;;  %v3298_v43 = vld [vmem:[#allocation5 + $0x368] ss:$12 sps:$4 sm:$0xff]  }
 0x11c   : > { %1814 = vmatmul.mubr.bf16.gmra.mxu1 %v3955_v11  ;;  %1703 = vmatprep.mubr.bf16.mxu0 %v4724_v5 }
 0x11d   : > { %2760 = vmatpush3.bf16.msra.mxu1 %v3282_v6  ;;  %1856 = vmatprep.mubr.bf16.mxu1 %v3595_v53  ;;  %v259_v53 = vld [vmem:[%s3581_s24 + $0x1b0] sm:$0xff]  ;;  %v3294_v6 = vld [vmem:[#allocation5 + $0x380] ss:$12 sps:$4 sm:$0xff]  }
 0x11e   : > { %2761 = vmatprep.subr.bf16.mxu1 %v3284_v13  ;;  %2872 = vmatpush3.bf16.msra.mxu0 %v3296_v17  ;;  %v3971_v13 = vpack.c.bf16 %v264_v7, %v259_v53  ;;  %v304_v7 = vld [vmem:[%s3581_s24 + $0x318] sm:$0xff] }
 0x11f   : > { %2873 = vmatprep.subr.bf16.mxu0 %v3297_v35 }
 0x121   : > { %2762 = vmatpush3.bf16.msra.mxu1 %v3285_v0  ;;  %v3300_v0 = vld [vmem:[#allocation5 + $0x350] ss:$12 sps:$4 sm:$0xff]  }
 0x122   : > { %2995 = vmatprep.subr.bf16.mxu1 %v3287_v63  ;;  %2874 = vmatpush3.bf16.msra.mxu0 %v3299_v51 }
 0x123   : > { %1704 = vmatmul.mubr.bf16.gmra.mxu0 %v3963_v29 }
 0x124   : > { %1857 = vmatmul.mubr.bf16.vlgmr.msra.gmra.mxu1 %v3609_v15  ;;  %1713 = vmatprep.mubr.bf16.mxu0 %v4724_v5  ;;  %v269_v15 = vld [vmem:[%s3581_s24 + $0x200] sm:$0xff] }
 0x125   : > { %2996 = vmatpush3.bf16.msra.mxu1 %v3287_v63  ;;  %1864 = vmatprep.mubr.bf16.mxu1 %v3613_v18  ;;  %v274_v18 = vld [vmem:[%s3581_s24 + $0x228] sm:$0xff] }
 0x126   : > { %2997 = vmatprep.subr.bf16.mxu1 %v3291_v55  ;;  %v3979_v9 = vpack.c.bf16 %v274_v18, %v269_v15  ;;  %v3302_v63 = vld [vmem:[#allocation5 + $0x320] ss:$12 sps:$4 sm:$0xff]  }
 0x129   : > { %2998 = vmatpush3.bf16.msra.mxu1 %v3291_v55  ;;  %v3303_v55 = vld [vmem:[#allocation5 + $0x308] ss:$12 sps:$4 sm:$0xff]  }
 0x12a   : > { %2999 = vmatprep.subr.bf16.mxu1 %v3294_v6 }
 0x12b   : > { %1714 = vmatmul.mubr.bf16.gmra.mxu0 %v3971_v13 }
 0x12c   : > { %1865 = vmatmul.mubr.bf16.gmra.mxu1 %v3629_v31  ;;  %1723 = vmatprep.mubr.bf16.mxu0 %v4724_v5  ;;  %v279_v31 = vld [vmem:[%s3581_s24 + $0x250] sm:$0xff] }
 0x12d   : > { %1872 = vmatprep.mubr.bf16.mxu1 %v3633_v33  ;;  %3000 = vmatpush3.bf16.msra.mxu1 %v3294_v6  ;;  %v284_v33 = vld [vmem:[%s3581_s24 + $0x278] sm:$0xff] }
 0x12e   : > { %3001 = vmatprep.subr.bf16.mxu1 %v3298_v43  ;;  %v3987_v17 = vpack.c.bf16 %v284_v33, %v279_v31 }
 0x131   : > { %3002 = vmatpush3.bf16.msra.mxu1 %v3298_v43 }
 0x132   : > { %3003 = vmatprep.subr.bf16.mxu1 %v3300_v0 }
 0x133   : > { %1724 = vmatmul.mubr.bf16.gmra.mxu0 %v3979_v9 }
 0x134   : > { %1873 = vmatmul.mubr.bf16.gmra.mxu1 %v3649_v47  ;;  %1733 = vmatprep.mubr.bf16.mxu0 %v4724_v5  ;;  %v289_v47 = vld [vmem:[%s3581_s24 + $0x2a0] sm:$0xff] }
 0x135   : > { %1880 = vmatprep.mubr.bf16.mxu1 %v3653_v49  ;;  %3004 = vmatpush3.bf16.msra.mxu1 %v3300_v0  ;;  %v294_v49 = vld [vmem:[%s3581_s24 + $0x2c8] sm:$0xff] }
 0x136   : > { %3005 = vmatprep.subr.bf16.mxu1 %v3301_v44  ;;  %v3995_v35 = vpack.c.bf16 %v294_v49, %v289_v47  ;;  %v309_v49 = vld [vmem:[%s3581_s24 + $0x340] sm:$0xff] }
 0x139   : > { %3006 = vmatpush3.bf16.msra.mxu1 %v3301_v44 }
 0x13a   : > { %3007 = vmatprep.subr.bf16.mxu1 %v3302_v63 }
 0x13b   : > { %1734 = vmatmul.mubr.bf16.gmra.mxu0 %v3987_v17 }
 0x13c   : > { %1881 = vmatmul.mubr.bf16.gmra.mxu1 %v3669_v1  ;;  %1743 = vmatprep.mubr.bf16.mxu0 %v4724_v5 }
 0x13d   : > { %1888 = vmatprep.mubr.bf16.mxu1 %v3673_v3  ;;  %3008 = vmatpush3.bf16.msra.mxu1 %v3302_v63  ;;  %v299_v3 = vld [vmem:[%s3581_s24 + $0x2f0] sm:$0xff] }
 0x13e   : > { %3009 = vmatprep.subr.bf16.mxu1 %v3303_v55  ;;  %v4007_v44 = vpack.c.bf16 %v304_v7, %v299_v3 }
 0x141   : > { %3010 = vmatpush3.bf16.msra.mxu1 %v3303_v55 }
 0x143   : > { %v1279_v51 = vpop.f32.mrf.mxu0  ;;  %1744 = vmatmul.mubr.bf16.gmra.mxu0 %v3995_v35 }
 0x144   : > { %v1472_v53 = vpop.f32.mrf.mxu1  ;;  %1889 = vmatmul.mubr.bf16.gmra.mxu1 %v3689_v20  ;;  %1753 = vmatprep.mubr.bf16.mxu0 %v4724_v5 }
 0x145   : > { %v3999_v1 = vadd.f32 %v1472_v53, %v1279_v51  ;;  %1896 = vmatprep.mubr.bf16.mxu1 %v3693_v22  ;;  %v1281_v6 = vpop.f32.mrf.mxu0  ;;  %v314_v51 = vld [vmem:[%s3581_s24 + $0x368] sm:$0xff] }
 0x146   : > { %v1474_v43 = vpop.f32.mrf.mxu1 }
 0x147   : > { %v4005_v15 = vadd.f32 %v1474_v43, %v1281_v6  ;;  %v1283_v18 = vpop.f32.mrf.mxu0 }
 0x148   : > { %v1476_v0 = vpop.f32.mrf.mxu1 }
 0x149   : > { %v4009_v31 = vadd.f32 %v1476_v0, %v1283_v18  ;;  %v1285_v20 = vpop.f32.mrf.mxu0  ;;  %v4023_v18 = vpack.c.bf16 %v314_v51, %v309_v49  ;;  %v319_v49 = vld [vmem:[%s3581_s24 + $0x390] sm:$0xff]  ;;  %v324_v51 = vld [vmem:[%s3581_s24 + $0x3b8] sm:$0xff] }
 0x14a   : > { %v1478_v33 = vpop.f32.mrf.mxu1 }
 0x14b   : > { %v4011_v63 = vadd.f32 %v1478_v33, %v1285_v20  ;;  %v1289_v55 = vpop.f32.mrf.mxu0  ;;  %1754 = vmatmul.mubr.bf16.gmra.mxu0 %v4007_v44 }
 0x14c   : > { %v1482_v22 = vpop.f32.mrf.mxu1  ;;  %1897 = vmatmul.mubr.bf16.gmra.mxu1 %v3709_v38  ;;  %1763 = vmatprep.mubr.bf16.mxu0 %v4724_v5 }
 0x14d   : > { %v4015_v47 = vadd.f32 %v1482_v22, %v1289_v55  ;;  %1904 = vmatprep.mubr.bf16.mxu1 %v3713_v40  ;;  %v1291_v53 = vpop.f32.mrf.mxu0 }
 0x14e   : > { %v1484_v3 = vpop.f32.mrf.mxu1 }
 0x14f   : > { %v4021_v7 = vadd.f32 %v1484_v3, %v1291_v53  ;;  %v1293_v6 = vpop.f32.mrf.mxu0 }
 0x150   : > { %v1486_v43 = vpop.f32.mrf.mxu1 }
 0x151   : > { %v4025_v0 = vadd.f32 %v1486_v43, %v1293_v6  ;;  %v1295_v38 = vpop.f32.mrf.mxu0 }
 0x152   : > { %v1488_v20 = vpop.f32.mrf.mxu1 }
 0x153   : > { %v4027_v33 = vadd.f32 %v1488_v20, %v1295_v38  ;;  %v1299_v55 = vpop.f32.mrf.mxu0  ;;  %1764 = vmatmul.mubr.bf16.gmra.mxu0 %v4023_v18  ;;  %v4039_v20 = vpack.c.bf16 %v324_v51, %v319_v49 }
 0x154   : > { %v1492_v40 = vpop.f32.mrf.mxu1  ;;  %1905 = vmatmul.mubr.bf16.gmra.mxu1 %v3729_v56  ;;  %1773 = vmatprep.mubr.bf16.mxu0 %v4724_v5 }
 0x155   : > { %4729 = vst [vmem:[#allocation34_spill] sm:$0xff] %v4027_v33  ;;  %v4031_v22 = vadd.f32 %v1492_v40, %v1299_v55  ;;  %1912 = vmatprep.mubr.bf16.mxu1 %v3733_v58  ;;  %v1301_v53 = vpop.f32.mrf.mxu0 }
 0x156   : > { %v1494_v3 = vpop.f32.mrf.mxu1 }
 0x157   : > { %v4037_v6 = vadd.f32 %v1494_v3, %v1301_v53  ;;  %v1303_v43 = vpop.f32.mrf.mxu0 }
 0x158   : > { %v1496_v38 = vpop.f32.mrf.mxu1 }
 0x159   : > { %v4041_v11 = vadd.f32 %v1496_v38, %v1303_v43  ;;  %v1305_v33 = vpop.f32.mrf.mxu0 }
 0x15a   : > { %v1498_v56 = vpop.f32.mrf.mxu1 }
 0x15b   : > { %4730 = vst [vmem:[#allocation35_spill] sm:$0xff] %v4041_v11  ;;  %v4043_v55 = vadd.f32 %v1498_v56, %v1305_v33  ;;  %v1309_v40 = vpop.f32.mrf.mxu0  ;;  %1774 = vmatmul.mubr.bf16.gmra.mxu0 %v4039_v20 }
 0x15c   : > { %v1502_v5 = vpop.f32.mrf.mxu1  ;;  %1913 = vmatmul.mubr.bf16.gmra.mxu1 %v3749_v8  ;;  %2017 = vmatprep.mubr.bf16.mxu0 %v3597_v54 }
 0x15d   : > { %4731 = vst [vmem:[#allocation36_spill] sm:$0xff] %v4043_v55  ;;  %v4047_v58 = vadd.f32 %v1502_v5, %v1309_v40  ;;  %1920 = vmatprep.mubr.bf16.mxu1 %v3753_v10  ;;  %v1311_v49 = vpop.f32.mrf.mxu0 }
 0x15e   : > { %v1504_v51 = vpop.f32.mrf.mxu1 }
 0x15f   : > { %v4051_v53 = vadd.f32 %v1504_v51, %v1311_v49  ;;  %v1313_v3 = vpop.f32.mrf.mxu0 }
 0x160   : > { %v1506_v43 = vpop.f32.mrf.mxu1 }
 0x161   : > { %v4053_v33 = vadd.f32 %v1506_v43, %v1313_v3  ;;  %v1315_v38 = vpop.f32.mrf.mxu0 }
 0x162   : > { %v1508_v56 = vpop.f32.mrf.mxu1 }
 0x163   : > { %v4055_v55 = vadd.f32 %v1508_v56, %v1315_v38  ;;  %v1319_v11 = vpop.f32.mrf.mxu0  ;;  %2018 = vmatmul.mubr.bf16.vlgmr.msra.gmra.mxu0 %v3611_v16 }
 0x164   : > { %v1512_v8 = vpop.f32.mrf.mxu1  ;;  %1921 = vmatmul.mubr.bf16.gmra.mxu1 %v3769_v28  ;;  %2025 = vmatprep.mubr.bf16.mxu0 %v3615_v19 }
 0x165   : > { %v4059_v10 = vadd.f32 %v1512_v8, %v1319_v11  ;;  %1928 = vmatprep.mubr.bf16.mxu1 %v3773_v30  ;;  %v1321_v54 = vpop.f32.mrf.mxu0 }
 0x166   : > { %v1514_v40 = vpop.f32.mrf.mxu1 }
 0x167   : > { %v4063_v5 = vadd.f32 %v1514_v40, %v1321_v54  ;;  %v1323_v49 = vpop.f32.mrf.mxu0 }
 0x168   : > { %v1516_v51 = vpop.f32.mrf.mxu1 }
 0x169   : > { %4732 = vst [vmem:[#allocation37_spill] sm:$0xff] %v4063_v5  ;;  %v4065_v3 = vadd.f32 %v1516_v51, %v1323_v49  ;;  %v1325_v43 = vpop.f32.mrf.mxu0 }
 0x16a   : > { %v1518_v38 = vpop.f32.mrf.mxu1 }
 0x16b   : > { %4733 = vst [vmem:[#allocation38_spill] sm:$0xff] %v4065_v3  ;;  %v4067_v56 = vadd.f32 %v1518_v38, %v1325_v43  ;;  %v1329_v28 = vpop.f32.mrf.mxu0  ;;  %2026 = vmatmul.mubr.bf16.gmra.mxu0 %v3631_v32 }
 0x16c   : > { %v1522_v16 = vpop.f32.mrf.mxu1  ;;  %1929 = vmatmul.mubr.bf16.gmra.mxu1 %v3789_v52  ;;  %2033 = vmatprep.mubr.bf16.mxu0 %v3635_v34 }
 0x16d   : > { %4734 = vst [vmem:[#allocation39_spill] sm:$0xff] %v4067_v56  ;;  %v4071_v30 = vadd.f32 %v1522_v16, %v1329_v28  ;;  %1936 = vmatprep.mubr.bf16.mxu1 %v3793_v60  ;;  %v1331_v19 = vpop.f32.mrf.mxu0 }
 0x16e   : > { %v1524_v11 = vpop.f32.mrf.mxu1 }
 0x16f   : > { %4735 = vst [vmem:[#allocation40_spill] sm:$0xff] %v4071_v30  ;;  %v4075_v8 = vadd.f32 %v1524_v11, %v1331_v19  ;;  %v1333_v54 = vpop.f32.mrf.mxu0 }
 0x170   : > { %v1526_v40 = vpop.f32.mrf.mxu1 }
 0x171   : > { %4736 = vst [vmem:[#allocation41_spill] sm:$0xff] %v4075_v8  ;;  %v4077_v49 = vadd.f32 %v1526_v40, %v1333_v54  ;;  %v1335_v51 = vpop.f32.mrf.mxu0 }
 0x172   : > { %v1528_v43 = vpop.f32.mrf.mxu1 }
 0x173   : > { %4737 = vst [vmem:[#allocation42_spill] sm:$0xff] %v4077_v49  ;;  %v4079_v38 = vadd.f32 %v1528_v43, %v1335_v51  ;;  %v1339_v52 = vpop.f32.mrf.mxu0  ;;  %2034 = vmatmul.mubr.bf16.gmra.mxu0 %v3651_v48 }
 0x174   : > { %v1532_v32 = vpop.f32.mrf.mxu1  ;;  %1937 = vmatmul.mubr.bf16.gmra.mxu1 %v3809_v14  ;;  %2041 = vmatprep.mubr.bf16.mxu0 %v3655_v50 }
 0x175   : > { %4738 = vst [vmem:[#allocation43_spill] sm:$0xff] %v4079_v38  ;;  %v4083_v60 = vadd.f32 %v1532_v32, %v1339_v52  ;;  %1944 = vmatprep.mubr.bf16.mxu1 %v3813_v24  ;;  %v1341_v34 = vpop.f32.mrf.mxu0 }
 0x176   : > { %v1534_v28 = vpop.f32.mrf.mxu1 }
 0x177   : > { %4739 = vst [vmem:[#allocation44_spill] sm:$0xff] %v4083_v60  ;;  %v4087_v16 = vadd.f32 %v1534_v28, %v1341_v34  ;;  %v1343_v19 = vpop.f32.mrf.mxu0  ;;  %v4776_v60 = vld [vmem:[#allocation22_spill] sm:$0xff] }
 0x178   : > { %v1536_v11 = vpop.f32.mrf.mxu1 }
 0x179   : > { %4740 = vst [vmem:[#allocation45_spill] sm:$0xff] %v4087_v16  ;;  %v4089_v54 = vadd.f32 %v1536_v11, %v1343_v19  ;;  %v1345_v40 = vpop.f32.mrf.mxu0 }
 0x17a   : > { %v1538_v51 = vpop.f32.mrf.mxu1 }
 0x17b   : > { %4741 = vst [vmem:[#allocation46_spill] sm:$0xff] %v4089_v54  ;;  %v4091_v43 = vadd.f32 %v1538_v51, %v1345_v40  ;;  %v1349_v14 = vpop.f32.mrf.mxu0  ;;  %2042 = vmatmul.mubr.bf16.gmra.mxu0 %v3671_v2  ;;  %v4775_v54 = vld [vmem:[#allocation21_spill] sm:$0xff] }
 0x17c   : > { %v1542_v48 = vpop.f32.mrf.mxu1  ;;  %1945 = vmatmul.mubr.bf16.gmra.mxu1 %v3829_v46  ;;  %2049 = vmatprep.mubr.bf16.mxu0 %v3675_v4 }
 0x17d   : > { %4742 = vst [vmem:[#allocation47_spill] sm:$0xff] %v4091_v43  ;;  %v4095_v24 = vadd.f32 %v1542_v48, %v1349_v14  ;;  %1952 = vmatprep.mubr.bf16.mxu1 %v3833_v62  ;;  %v1351_v50 = vpop.f32.mrf.mxu0 }
 0x17e   : > { %v1544_v52 = vpop.f32.mrf.mxu1 }
 0x17f   : > { %4743 = vst [vmem:[#allocation48_spill] sm:$0xff] %v4095_v24  ;;  %v4099_v32 = vadd.f32 %v1544_v52, %v1351_v50  ;;  %v1353_v34 = vpop.f32.mrf.mxu0 }
 0x180   : > { %v1546_v28 = vpop.f32.mrf.mxu1 }
 0x181   : > { %4744 = vst [vmem:[#allocation49_spill] sm:$0xff] %v4099_v32  ;;  %v4101_v19 = vadd.f32 %v1546_v28, %v1353_v34  ;;  %v1355_v11 = vpop.f32.mrf.mxu0 }
 0x182   : > { %v1548_v40 = vpop.f32.mrf.mxu1 }
 0x183   : > { %4745 = vst [vmem:[#allocation50_spill] sm:$0xff] %v4101_v19  ;;  %v4103_v51 = vadd.f32 %v1548_v40, %v1355_v11  ;;  %v1359_v46 = vpop.f32.mrf.mxu0  ;;  %2050 = vmatmul.mubr.bf16.gmra.mxu0 %v3691_v21 }
 0x184   : > { %v1552_v2 = vpop.f32.mrf.mxu1  ;;  %1953 = vmatmul.mubr.bf16.gmra.mxu1 %v3849_v36  ;;  %2057 = vmatprep.mubr.bf16.mxu0 %v3695_v23 }
 0x185   : > { %4746 = vst [vmem:[#allocation51_spill] sm:$0xff] %v4103_v51  ;;  %v4107_v62 = vadd.f32 %v1552_v2, %v1359_v46  ;;  %1960 = vmatprep.mubr.bf16.mxu1 %v3853_v42  ;;  %v1361_v4 = vpop.f32.mrf.mxu0 }
 0x186   : > { %v1554_v14 = vpop.f32.mrf.mxu1 }
 0x187   : > { %4747 = vst [vmem:[#allocation52_spill] sm:$0xff] %v4107_v62  ;;  %v4111_v48 = vadd.f32 %v1554_v14, %v1361_v4  ;;  %v1363_v50 = vpop.f32.mrf.mxu0 }
 0x188   : > { %v1556_v52 = vpop.f32.mrf.mxu1 }
 0x189   : > { %4748 = vst [vmem:[#allocation53_spill] sm:$0xff] %v4111_v48  ;;  %v4113_v34 = vadd.f32 %v1556_v52, %v1363_v50  ;;  %v1365_v28 = vpop.f32.mrf.mxu0 }
 0x18a   : > { %v1558_v11 = vpop.f32.mrf.mxu1 }
 0x18b   : > { %4749 = vst [vmem:[#allocation54_spill] sm:$0xff] %v4113_v34  ;;  %v4115_v40 = vadd.f32 %v1558_v11, %v1365_v28  ;;  %v1369_v36 = vpop.f32.mrf.mxu0  ;;  %2058 = vmatmul.mubr.bf16.gmra.mxu0 %v3711_v39 }
 0x18c   : > { %v1562_v21 = vpop.f32.mrf.mxu1  ;;  %1961 = vmatmul.mubr.bf16.gmra.mxu1 %v3869_v26  ;;  %2065 = vmatprep.mubr.bf16.mxu0 %v3715_v41 }
 0x18d   : > { %4750 = vst [vmem:[#allocation55_spill] sm:$0xff] %v4115_v40  ;;  %v4119_v42 = vadd.f32 %v1562_v21, %v1369_v36  ;;  %1968 = vmatprep.mubr.bf16.mxu1 %v3873_v37  ;;  %v1371_v23 = vpop.f32.mrf.mxu0 }
 0x18e   : > { %v1564_v46 = vpop.f32.mrf.mxu1 }
 0x18f   : > { %4751 = vst [vmem:[#allocation56_spill] sm:$0xff] %v4119_v42  ;;  %v4123_v2 = vadd.f32 %v1564_v46, %v1371_v23  ;;  %v1373_v4 = vpop.f32.mrf.mxu0 }
 0x190   : > { %v1566_v14 = vpop.f32.mrf.mxu1 }
 0x191   : > { %4752 = vst [vmem:[#allocation57_spill] sm:$0xff] %v4123_v2  ;;  %v4125_v50 = vadd.f32 %v1566_v14, %v1373_v4  ;;  %v1375_v52 = vpop.f32.mrf.mxu0 }
 0x192   : > { %v1568_v28 = vpop.f32.mrf.mxu1 }
 0x193   : > { %4753 = vst [vmem:[#allocation58_spill] sm:$0xff] %v4125_v50  ;;  %v4127_v11 = vadd.f32 %v1568_v28, %v1375_v52  ;;  %v1379_v26 = vpop.f32.mrf.mxu0  ;;  %2066 = vmatmul.mubr.bf16.gmra.mxu0 %v3731_v57 }
 0x194   : > { %v1572_v39 = vpop.f32.mrf.mxu1  ;;  %1969 = vmatmul.mubr.bf16.gmra.mxu1 %v3889_v12  ;;  %2073 = vmatprep.mubr.bf16.mxu0 %v3735_v59  ;;  %v4761_v59 = vld [vmem:[#allocation12_spill] sm:$0xff] }
 0x195   : > { %4754 = vst [vmem:[#allocation59_spill] sm:$0xff] %v4127_v11  ;;  %v4131_v37 = vadd.f32 %v1572_v39, %v1379_v26  ;;  %1976 = vmatprep.mubr.bf16.mxu1 %v3893_v27  ;;  %v1381_v41 = vpop.f32.mrf.mxu0  ;;  %v4759_v26 = vld [vmem:[#allocation11_spill] sm:$0xff]  ;;  %v4762_v39 = vld [vmem:[#allocation28_spill] sm:$0xff] }
 0x196   : > { %v1574_v36 = vpop.f32.mrf.mxu1 }
 0x197   : > { %4755 = vst [vmem:[#allocation60_spill] sm:$0xff] %v4131_v37  ;;  %v4135_v21 = vadd.f32 %v1574_v36, %v1381_v41  ;;  %v1383_v23 = vpop.f32.mrf.mxu0 }
 0x198   : > { %v1576_v46 = vpop.f32.mrf.mxu1 }
 0x199   : > { %4756 = vst [vmem:[#allocation61_spill] sm:$0xff] %v4135_v21  ;;  %v4137_v4 = vadd.f32 %v1576_v46, %v1383_v23  ;;  %v1385_v14 = vpop.f32.mrf.mxu0 }
 0x19a   : > { %v1578_v52 = vpop.f32.mrf.mxu1 }
 0x19b   : > { %4757 = vst [vmem:[#allocation62_spill] sm:$0xff] %v4137_v4  ;;  %v4139_v28 = vadd.f32 %v1578_v52, %v1385_v14  ;;  %v1389_v12 = vpop.f32.mrf.mxu0  ;;  %2074 = vmatmul.mubr.bf16.gmra.mxu0 %v4759_v26 }
 0x19c   : > { %v1582_v57 = vpop.f32.mrf.mxu1  ;;  %1977 = vmatmul.mubr.bf16.gmra.mxu1 %v3905_v45  ;;  %2081 = vmatprep.mubr.bf16.mxu0 %v4761_v59  ;;  %v4768_v59 = vld [vmem:[#allocation14_spill] sm:$0xff] }
 0x19d   : > { %4758 = vst [vmem:[#allocation63_spill] sm:$0xff] %v4139_v28  ;;  %v4143_v27 = vadd.f32 %v1582_v57, %v1389_v12  ;;  %3011 = vmatprep.mubr.bf16.mxu1 %v4762_v39  ;;  %v1391_v41 = vpop.f32.mrf.mxu0  ;;  %v4766_v12 = vld [vmem:[#allocation13_spill] sm:$0xff]  ;;  %v4767_v57 = vld [vmem:[#allocation30_spill] sm:$0xff] }
 0x19e   : > { %v1584_v36 = vpop.f32.mrf.mxu1 }
 0x19f   : > { %4760 = vst [vmem:[#allocation11_spill] sm:$0xff] %v4143_v27  ;;  %v4147_v23 = vadd.f32 %v1584_v36, %v1391_v41  ;;  %v1393_v46 = vpop.f32.mrf.mxu0 }
 0x1a0   : > { %v1586_v4 = vpop.f32.mrf.mxu1 }
 0x1a1   : > { %4763 = vst [vmem:[#allocation12_spill] sm:$0xff] %v4147_v23  ;;  %v4149_v14 = vadd.f32 %v1586_v4, %v1393_v46  ;;  %v1395_v52 = vpop.f32.mrf.mxu0 }
 0x1a2   : > { %v1588_v28 = vpop.f32.mrf.mxu1 }
 0x1a3   : > { %4764 = vst [vmem:[#allocation28_spill] sm:$0xff] %v4149_v14  ;;  %v4151_v21 = vadd.f32 %v1588_v28, %v1395_v52  ;;  %v1399_v45 = vpop.f32.mrf.mxu0  ;;  %2082 = vmatmul.mubr.bf16.gmra.mxu0 %v4766_v12  ;;  %v4769_v52 = vld [vmem:[#allocation15_spill] sm:$0xff]  ;;  %v4770_v12 = vld [vmem:[#allocation16_spill] sm:$0xff] }
 0x1a4   : > { %v1592_v26 = vpop.f32.mrf.mxu1  ;;  %3012 = vmatmul.mubr.bf16.vlgmr.msra.gmra.mxu1 %v4767_v57  ;;  %2089 = vmatprep.mubr.bf16.mxu0 %v4768_v59 }
 0x1a5   : > { %4765 = vst [vmem:[#allocation64_spill] sm:$0xff] %v4151_v21  ;;  %3015 = vmatprep.mubr.bf16.mxu1 %v3941_v25  ;;  %v1401_v39 = vpop.f32.mrf.mxu0 }
 0x1a6   : > { %v1594_v41 = vpop.f32.mrf.mxu1 }
 0x1a7   : > { %v1403_v36 = vpop.f32.mrf.mxu0 }
 0x1a8   : > { %v1596_v23 = vpop.f32.mrf.mxu1 }
 0x1a9   : > { %v1405_v4 = vpop.f32.mrf.mxu0  ;;  %v1597_v38 = vadd.f32 %v1596_v23, %v1403_v36  ;;  %v4779_v36 = vld [vmem:[#allocation29_spill] sm:$0xff] }
 0x1aa   : > { %v1598_v46 = vpop.f32.mrf.mxu1 }
 0x1ab   : > { %v4157_v14 = vpop.f32.mrf.mxu0  ;;  %2090 = vmatmul.mubr.bf16.gmra.mxu0 %v4769_v52  ;;  %v1599_v3 = vadd.f32 %v1598_v46, %v1405_v4 }
 0x1ac   : > { %v4159_v28 = vpop.f32.mrf.mxu1  ;;  %3016 = vmatmul.mubr.bf16.gmra.mxu1 %v3953_v61  ;;  %2097 = vmatprep.mubr.bf16.mxu0 %v4770_v12  ;;  %v4771_v61 = vld [vmem:[#allocation17_spill] sm:$0xff] }
 0x1ad   : > { %3019 = vmatprep.mubr.bf16.mxu1 %v3963_v29  ;;  %v4165_v57 = vpop.f32.mrf.mxu0  ;;  %v4772_v29 = vld [vmem:[#allocation18_spill] sm:$0xff] }
 0x1ae   : > { %v4167_v25 = vpop.f32.mrf.mxu1 }
 0x1af   : > { %v4169_v59 = vpop.f32.mrf.mxu0 }
 0x1b0   : > { %v4171_v21 = vpop.f32.mrf.mxu1 }
 0x1b1   : > { %v4173_v27 = vpop.f32.mrf.mxu0  ;;  %v1607_v4 = vadd.f32 %v4171_v21, %v4169_v59 }
 0x1b2   : > { %v4175_v37 = vpop.f32.mrf.mxu1 }
 0x1b3   : > { %v4177_v11 = vpop.f32.mrf.mxu0  ;;  %2098 = vmatmul.mubr.bf16.gmra.mxu0 %v4771_v61 }
 0x1b4   : > { %v4179_v52 = vpop.f32.mrf.mxu1  ;;  %3020 = vmatmul.mubr.bf16.gmra.mxu1 %v3971_v13  ;;  %2105 = vmatprep.mubr.bf16.mxu0 %v4772_v29  ;;  %v4773_v29 = vld [vmem:[#allocation19_spill] sm:$0xff] }
 0x1b5   : > { %3023 = vmatprep.mubr.bf16.mxu1 %v3979_v9  ;;  %v4185_v12 = vpop.f32.mrf.mxu0  ;;  %v4774_v9 = vld [vmem:[#allocation20_spill] sm:$0xff] }
 0x1b6   : > { %v4187_v50 = vpop.f32.mrf.mxu1 }
 0x1b7   : > { %v4189_v2 = vpop.f32.mrf.mxu0 }
 0x1b8   : > { %v4191_v42 = vpop.f32.mrf.mxu1 }
 0x1b9   : > { %v4193_v40 = vpop.f32.mrf.mxu0 }
 0x1ba   : > { %v4195_v34 = vpop.f32.mrf.mxu1 }
 0x1bb   : > { %v4197_v61 = vpop.f32.mrf.mxu0  ;;  %2106 = vmatmul.mubr.bf16.gmra.mxu0 %v4773_v29  ;;  %v1593_v29 = vadd.f32 %v1592_v26, %v1399_v45 }
 0x1bc   : > { %v4199_v13 = vpop.f32.mrf.mxu1  ;;  %3024 = vmatmul.mubr.bf16.gmra.mxu1 %v3987_v17  ;;  %2113 = vmatprep.mubr.bf16.mxu0 %v4774_v9 }
 0x1bd   : > { %3027 = vmatprep.mubr.bf16.mxu1 %v3995_v35  ;;  %v4205_v48 = vpop.f32.mrf.mxu0  ;;  %v1595_v35 = vadd.f32 %v1594_v41, %v1401_v39 }
 0x1be   : > { %v4207_v62 = vpop.f32.mrf.mxu1 }
 0x1bf   : > { %v4209_v51 = vpop.f32.mrf.mxu0 }
 0x1c0   : > { %v4211_v19 = vpop.f32.mrf.mxu1 }
 0x1c1   : > { %v4213_v32 = vpop.f32.mrf.mxu0 }
 0x1c2   : > { %v4215_v24 = vpop.f32.mrf.mxu1 }
 0x1c3   : > { %v1665_v43 = vpop.f32.mrf.mxu0  ;;  %2114 = vmatmul.mubr.bf16.gmra.mxu0 %v4775_v54 }
 0x1c4   : > { %v1785_v17 = vpop.f32.mrf.mxu1  ;;  %3028 = vmatmul.mubr.bf16.gmra.mxu1 %v4007_v44  ;;  %v1666_v9 = vadd.f32 %v1665_v43, %v3999_v1  ;;  %2121 = vmatprep.mubr.bf16.mxu0 %v4776_v60 }
 0x1c5   : > { %v1786_v16 = vadd.f32 %v1785_v17, %v1593_v29  ;;  %3031 = vmatprep.mubr.bf16.mxu1 %v4023_v18  ;;  %v1667_v49 = vpop.f32.mrf.mxu0  ;;  %v1609_v29 = vadd.f32 %v4175_v37, %v4173_v27  ;;  %v4780_v27 = vld [vmem:[#allocation34_spill] sm:$0xff] }
 0x1c6   : > { %v1787_v8 = vpop.f32.mrf.mxu1  ;;  %v2307_v30 = vmax.f32 %v1666_v9, 0.0  ;;  %v1668_v45 = vadd.f32 %v1667_v49, %v4005_v15  ;;  %v1603_v15 = vadd.f32 %v4159_v28, %v4157_v14 }
 0x1c7   : > { %v2379_v56 = vmax.f32 %v1786_v16, 0.0  ;;  %v1788_v26 = vadd.f32 %v1787_v8, %v1595_v35  ;;  %v1669_v54 = vpop.f32.mrf.mxu0 }
 0x1c8   : > { %v1789_v5 = vpop.f32.mrf.mxu1  ;;  %2403 = vst [vmem:[%s4224_s19] sm:$0xff] %v2307_v30  ;;  %v2308_v1 = vmax.f32 %v1668_v45, 0.0  ;;  %v1670_v18 = vadd.f32 %v1669_v54, %v4009_v31 }
 0x1c9   : > { %2475 = vst [vmem:[%s4224_s19 + $0x240] sm:$0xff] %v2379_v56  ;;  %v2380_v44 = vmax.f32 %v1788_v26, 0.0  ;;  %v1790_v60 = vadd.f32 %v1789_v5, %v1597_v38  ;;  %v1671_v8 = vpop.f32.mrf.mxu0  ;;  %v1605_v56 = vadd.f32 %v4167_v25, %v4165_v57  ;;  %v4777_v38 = vld [vmem:[#allocation23_spill] sm:$0xff]  ;;  %v1613_v26 = vadd.f32 %v4179_v52, %v4177_v11 }
 0x1ca   : > { %v1791_v49 = vpop.f32.mrf.mxu1  ;;  %2404 = vst [vmem:[%s4224_s19 + $0x8] sm:$0xff] %v2308_v1  ;;  %v2310_v16 = vmax.f32 %v1670_v18, 0.0  ;;  %v1672_v23 = vadd.f32 %v1671_v8, %v4011_v63  ;;  %v4781_v8 = vld [vmem:[#allocation25_spill] sm:$0xff] }
 0x1cb   : > { %2476 = vst [vmem:[%s4224_s19 + $0x248] sm:$0xff] %v2380_v44  ;;  %v2382_v43 = vmax.f32 %v1790_v60, 0.0  ;;  %v1792_v30 = vadd.f32 %v1791_v49, %v1599_v3  ;;  %v1675_v31 = vpop.f32.mrf.mxu0  ;;  %2122 = vmatmul.mubr.bf16.gmra.mxu0 %v4777_v38  ;;  %v4778_v3 = vld [vmem:[#allocation24_spill] sm:$0xff]  ;;  %v1615_v60 = vadd.f32 %v4187_v50, %v4185_v12  ;;  %v4782_v49 = vld [vmem:[#allocation31_spill] sm:$0xff]  ;;  %v1617_v12 = vadd.f32 %v4191_v42, %v4189_v2 }
 0x1cc   : > { %v1795_v5 = vpop.f32.mrf.mxu1  ;;  %3032 = vmatmul.mubr.bf16.gmra.mxu1 %v4039_v20  ;;  %2406 = vst [vmem:[%s4224_s19 + $0x18] sm:$0xff] %v2310_v16  ;;  %v2311_v14 = vmax.f32 %v1672_v23, 0.0  ;;  %v1676_v41 = vadd.f32 %v1675_v31, %v4015_v47  ;;  %2129 = vmatprep.mubr.bf16.mxu0 %v4778_v3  ;;  %v4783_v23 = vld [vmem:[#allocation26_spill] sm:$0xff]  ;;  %v4784_v50 = vld [vmem:[#allocation32_spill] sm:$0xff]  ;;  %v4785_v2 = vld [vmem:[#allocation35_spill] sm:$0xff] }
 0x1cd   : > { %2478 = vst [vmem:[%s4224_s19 + $0x258] sm:$0xff] %v2382_v43  ;;  %v2383_v39 = vmax.f32 %v1792_v30, 0.0  ;;  %v1796_v63 = vadd.f32 %v1795_v5, %v1603_v15  ;;  %3035 = vmatprep.mubr.bf16.mxu1 %v4779_v36  ;;  %v1677_v46 = vpop.f32.mrf.mxu0 }
 0x1ce   : > { %v1797_v28 = vpop.f32.mrf.mxu1  ;;  %2407 = vst [vmem:[%s4224_s19 + $0x20] sm:$0xff] %v2311_v14  ;;  %v2313_v20 = vmax.f32 %v1676_v41, 0.0  ;;  %v1678_v47 = vadd.f32 %v1677_v46, %v4021_v7  ;;  %v1619_v14 = vadd.f32 %v4195_v34, %v4193_v40  ;;  %v4786_v40 = vld [vmem:[#allocation36_spill] sm:$0xff] }
 0x1cf   : > { %2479 = vst [vmem:[%s4224_s19 + $0x260] sm:$0xff] %v2383_v39  ;;  %v2385_v57 = vmax.f32 %v1796_v63, 0.0  ;;  %v1798_v25 = vadd.f32 %v1797_v28, %v1605_v56  ;;  %v1679_v17 = vpop.f32.mrf.mxu0 }
 0x1d0   : > { %v1799_v35 = vpop.f32.mrf.mxu1  ;;  %2409 = vst [vmem:[%s4224_s19 + $0x30] sm:$0xff] %v2313_v20  ;;  %v2314_v9 = vmax.f32 %v1678_v47, 0.0  ;;  %v1680_v59 = vadd.f32 %v1679_v17, %v4025_v0  ;;  %v1625_v47 = vadd.f32 %v4207_v62, %v4205_v48  ;;  %v4787_v17 = vld [vmem:[#allocation27_spill] sm:$0xff] }
 0x1d1   : > { %2481 = vst [vmem:[%s4224_s19 + $0x270] sm:$0xff] %v2385_v57  ;;  %v2386_v21 = vmax.f32 %v1798_v25, 0.0  ;;  %v1800_v45 = vadd.f32 %v1799_v35, %v1607_v4  ;;  %v1681_v54 = vpop.f32.mrf.mxu0  ;;  %v1623_v4 = vadd.f32 %v4199_v13, %v4197_v61  ;;  %v4788_v35 = vld [vmem:[#allocation33_spill] sm:$0xff] }
 0x1d2   : > { %v1801_v7 = vpop.f32.mrf.mxu1  ;;  %2410 = vst [vmem:[%s4224_s19 + $0x38] sm:$0xff] %v2314_v9  ;;  %v2316_v1 = vmax.f32 %v1680_v59, 0.0  ;;  %v1682_v44 = vadd.f32 %v1681_v54, %v4780_v27  ;;  %v1627_v59 = vadd.f32 %v4211_v19, %v4209_v51 }
 0x1d3   : > { %2482 = vst [vmem:[%s4224_s19 + $0x278] sm:$0xff] %v2386_v21  ;;  %v2388_v37 = vmax.f32 %v1800_v45, 0.0  ;;  %v1802_v18 = vadd.f32 %v1801_v7, %v1609_v29  ;;  %v1685_v0 = vpop.f32.mrf.mxu0  ;;  %2130 = vmatmul.mubr.bf16.gmra.mxu0 %v4781_v8 }
 0x1d4   : > { %v1805_v15 = vpop.f32.mrf.mxu1  ;;  %3036 = vmatmul.mubr.bf16.gmra.mxu1 %v4782_v49  ;;  %2412 = vst [vmem:[%s4224_s19 + $0x48] sm:$0xff] %v2316_v1  ;;  %v2317_v11 = vmax.f32 %v1682_v44, 0.0  ;;  %v1686_v16 = vadd.f32 %v1685_v0, %v4031_v22  ;;  %2137 = vmatprep.mubr.bf16.mxu0 %v4783_v23  ;;  %v1629_v1 = vadd.f32 %v4215_v24, %v4213_v32  ;;  %v4789_v23 = vld [vmem:[#allocation37_spill] sm:$0xff] }
 0x1d5   : > { %2484 = vst [vmem:[%s4224_s19 + $0x288] sm:$0xff] %v2388_v37  ;;  %v2389_v52 = vmax.f32 %v1802_v18, 0.0  ;;  %v1806_v43 = vadd.f32 %v1805_v15, %v1613_v26  ;;  %3039 = vmatprep.mubr.bf16.mxu1 %v4784_v50  ;;  %v1687_v30 = vpop.f32.mrf.mxu0 }
 0x1d6   : > { %v1807_v56 = vpop.f32.mrf.mxu1  ;;  %2413 = vst [vmem:[%s4224_s19 + $0x50] sm:$0xff] %v2317_v11  ;;  %v2319_v31 = vmax.f32 %v1686_v16, 0.0  ;;  %v1688_v22 = vadd.f32 %v1687_v30, %v4037_v6 }
 0x1d7   : > { %2485 = vst [vmem:[%s4224_s19 + $0x290] sm:$0xff] %v2389_v52  ;;  %v2391_v5 = vmax.f32 %v1806_v43, 0.0  ;;  %v1808_v38 = vadd.f32 %v1807_v56, %v1615_v60  ;;  %v1689_v39 = vpop.f32.mrf.mxu0 }
 0x1d8   : > { %v1809_v41 = vpop.f32.mrf.mxu1  ;;  %2415 = vst [vmem:[%s4224_s19 + $0x60] sm:$0xff] %v2319_v31  ;;  %v2320_v63 = vmax.f32 %v1688_v22, 0.0  ;;  %v1690_v3 = vadd.f32 %v1689_v39, %v4785_v2  ;;  %v4790_v31 = vld [vmem:[#allocation38_spill] sm:$0xff] }
 0x1d9   : > { %2487 = vst [vmem:[%s4224_s19 + $0x2a0] sm:$0xff] %v2391_v5  ;;  %v2392_v42 = vmax.f32 %v1808_v38, 0.0  ;;  %v1810_v36 = vadd.f32 %v1809_v41, %v1617_v12  ;;  %v1691_v46 = vpop.f32.mrf.mxu0 }
 0x1da   : > { %v1811_v6 = vpop.f32.mrf.mxu1  ;;  %2416 = vst [vmem:[%s4224_s19 + $0x68] sm:$0xff] %v2320_v63  ;;  %v2322_v28 = vmax.f32 %v1690_v3, 0.0  ;;  %v1692_v20 = vadd.f32 %v1691_v46, %v4786_v40  ;;  %v4792_v3 = vld [vmem:[#allocation40_spill] sm:$0xff] }
 0x1db   : > { %2488 = vst [vmem:[%s4224_s19 + $0x2a8] sm:$0xff] %v2392_v42  ;;  %v2394_v34 = vmax.f32 %v1810_v36, 0.0  ;;  %v1812_v57 = vadd.f32 %v1811_v6, %v1619_v14  ;;  %v1695_v25 = vpop.f32.mrf.mxu0  ;;  %2138 = vmatmul.mubr.bf16.gmra.mxu0 %v4787_v17  ;;  %v4791_v14 = vld [vmem:[#allocation39_spill] sm:$0xff] }
 0x1dc   : > { %v1815_v29 = vpop.f32.mrf.mxu1  ;;  %3040 = vmatmul.mubr.bf16.gmra.mxu1 %v4788_v35  ;;  %2418 = vst [vmem:[%s4224_s19 + $0x78] sm:$0xff] %v2322_v28  ;;  %v2323_v61 = vmax.f32 %v1692_v20, 0.0  ;;  %v1696_v9 = vadd.f32 %v1695_v25, %v4047_v58  ;;  %v4793_v28 = vld [vmem:[#allocation41_spill] sm:$0xff]  ;;  %v4794_v25 = vld [vmem:[#allocation42_spill] sm:$0xff] }
 0x1dd   : > { %2490 = vst [vmem:[%s4224_s19 + $0x2b8] sm:$0xff] %v2394_v34  ;;  %v2395_v13 = vmax.f32 %v1812_v57, 0.0  ;;  %v1816_v21 = vadd.f32 %v1815_v29, %v1623_v4  ;;  %v1697_v45 = vpop.f32.mrf.mxu0 }
 0x1de   : > { %v1817_v62 = vpop.f32.mrf.mxu1  ;;  %2419 = vst [vmem:[%s4224_s19 + $0x80] sm:$0xff] %v2323_v61  ;;  %v2325_v48 = vmax.f32 %v1696_v9, 0.0  ;;  %v1698_v54 = vadd.f32 %v1697_v45, %v4051_v53 }
 0x1df   : > { %2491 = vst [vmem:[%s4224_s19 + $0x2c0] sm:$0xff] %v2395_v13  ;;  %v2397_v26 = vmax.f32 %v1816_v21, 0.0  ;;  %v1818_v7 = vadd.f32 %v1817_v62, %v1625_v47  ;;  %v1699_v37 = vpop.f32.mrf.mxu0  ;;  %v4795_v13 = vld [vmem:[#allocation43_spill] sm:$0xff] }
 0x1e0   : > { %v1819_v58 = vpop.f32.mrf.mxu1  ;;  %2421 = vst [vmem:[%s4224_s19 + $0x90] sm:$0xff] %v2325_v48  ;;  %v2326_v19 = vmax.f32 %v1698_v54, 0.0  ;;  %v1700_v27 = vadd.f32 %v1699_v37, %v4053_v33  ;;  %v4796_v48 = vld [vmem:[#allocation44_spill] sm:$0xff]  ;;  %v4797_v37 = vld [vmem:[#allocation45_spill] sm:$0xff] }
 0x1e1   : > { %2493 = vst [vmem:[%s4224_s19 + $0x2d0] sm:$0xff] %v2397_v26  ;;  %v2398_v51 = vmax.f32 %v1818_v7, 0.0  ;;  %v1820_v44 = vadd.f32 %v1819_v58, %v1627_v59  ;;  %v1701_v18 = vpop.f32.mrf.mxu0 }
 0x1e2   : > { %v1821_v60 = vpop.f32.mrf.mxu1  ;;  %2422 = vst [vmem:[%s4224_s19 + $0x98] sm:$0xff] %v2326_v19  ;;  %v2328_v53 = vmax.f32 %v1700_v27, 0.0  ;;  %v1702_v24 = vadd.f32 %v1701_v18, %v4055_v55  ;;  %v4798_v18 = vld [vmem:[#allocation46_spill] sm:$0xff] }
 0x1e3   : > { %2494 = vst [vmem:[%s4224_s19 + $0x2d8] sm:$0xff] %v2398_v51  ;;  %v2400_v0 = vmax.f32 %v1820_v44, 0.0  ;;  %v1822_v32 = vadd.f32 %v1821_v60, %v1629_v1  ;;  %v1705_v15 = vpop.f32.mrf.mxu0 }
 0x1e4   : > { %v2763_v8 = vpop.f32.mrf.mxu1  ;;  %2424 = vst [vmem:[%s4224_s19 + $0xa8] sm:$0xff] %v2328_v53  ;;  %v2329_v49 = vmax.f32 %v1702_v24, 0.0  ;;  %v1706_v33 = vadd.f32 %v1705_v15, %v4059_v10 }
 0x1e5   : > { %2496 = vst [vmem:[%s4224_s19 + $0x2e8] sm:$0xff] %v2400_v0  ;;  %v2401_v11 = vmax.f32 %v1822_v32, 0.0  ;;  %v1707_v52 = vpop.f32.mrf.mxu0  ;;  %v4799_v32 = vld [vmem:[#allocation47_spill] sm:$0xff] }
 0x1e6   : > { %v2764_v16 = vpop.f32.mrf.mxu1  ;;  %2425 = vst [vmem:[%s4224_s19 + $0xb0] sm:$0xff] %v2329_v49  ;;  %v2331_v43 = vmax.f32 %v1706_v33, 0.0  ;;  %v1708_v50 = vadd.f32 %v1707_v52, %v4789_v23  ;;  %v4800_v52 = vld [vmem:[#allocation48_spill] sm:$0xff] }
 0x1e7   : > { %2497 = vst [vmem:[%s4224_s19 + $0x2f0] sm:$0xff] %v2401_v11  ;;  %v4308_v55 = vadd.f32 %v2764_v16, %v2763_v8  ;;  %v1709_v12 = vpop.f32.mrf.mxu0 }
 0x1e8   : > { %v2766_v30 = vpop.f32.mrf.mxu1  ;;  %2427 = vst [vmem:[%s4224_s19 + $0xc0] sm:$0xff] %v2331_v43  ;;  %v2332_v56 = vmax.f32 %v1708_v50, 0.0  ;;  %v1710_v5 = vadd.f32 %v1709_v12, %v4790_v31  ;;  %v4801_v12 = vld [vmem:[#allocation49_spill] sm:$0xff] }
 0x1e9   : > { %v1711_v22 = vpop.f32.mrf.mxu0 }
 0x1ea   : > { %v2767_v38 = vpop.f32.mrf.mxu1  ;;  %2428 = vst [vmem:[%s4224_s19 + $0xc8] sm:$0xff] %v2332_v56  ;;  %v2334_v10 = vmax.f32 %v1710_v5, 0.0  ;;  %v1712_v39 = vadd.f32 %v1711_v22, %v4791_v14 }
 0x1eb   : > { %v4314_v41 = vadd.f32 %v2767_v38, %v2766_v30  ;;  %v1715_v63 = vpop.f32.mrf.mxu0  ;;  %v4802_v38 = vld [vmem:[#allocation50_spill] sm:$0xff] }
 0x1ec   : > { %v2769_v42 = vpop.f32.mrf.mxu1  ;;  %2430 = vst [vmem:[%s4224_s19 + $0xd8] sm:$0xff] %v2334_v10  ;;  %v2335_v2 = vmax.f32 %v1712_v39, 0.0  ;;  %v1716_v36 = vadd.f32 %v1715_v63, %v4792_v3 }
 0x1ed   : > { %v1717_v4 = vpop.f32.mrf.mxu0 }
 0x1ee   : > { %v2770_v46 = vpop.f32.mrf.mxu1  ;;  %2431 = vst [vmem:[%s4224_s19 + $0xe0] sm:$0xff] %v2335_v2  ;;  %v2337_v6 = vmax.f32 %v1716_v36, 0.0  ;;  %v1718_v34 = vadd.f32 %v1717_v4, %v4793_v28 }
 0x1ef   : > { %v4320_v40 = vadd.f32 %v2770_v46, %v2769_v42  ;;  %v1719_v20 = vpop.f32.mrf.mxu0  ;;  %v4803_v42 = vld [vmem:[#allocation51_spill] sm:$0xff] }
 0x1f0   : > { %v2772_v57 = vpop.f32.mrf.mxu1  ;;  %2433 = vst [vmem:[%s4224_s19 + $0xf0] sm:$0xff] %v2337_v6  ;;  %v2338_v47 = vmax.f32 %v1718_v34, 0.0  ;;  %v1720_v29 = vadd.f32 %v1719_v20, %v4794_v25  ;;  %v4804_v6 = vld [vmem:[#allocation52_spill] sm:$0xff] }
 0x1f1   : > { %v1721_v17 = vpop.f32.mrf.mxu0 }
 0x1f2   : > { %v2773_v35 = vpop.f32.mrf.mxu1  ;;  %2434 = vst [vmem:[%s4224_s19 + $0xf8] sm:$0xff] %v2338_v47  ;;  %v2340_v61 = vmax.f32 %v1720_v29, 0.0  ;;  %v1722_v9 = vadd.f32 %v1721_v17, %v4795_v13  ;;  %v4805_v47 = vld [vmem:[#allocation53_spill] sm:$0xff]  ;;  %v4806_v13 = vld [vmem:[#allocation54_spill] sm:$0xff] }
 0x1f3   : > { %v4326_v21 = vadd.f32 %v2773_v35, %v2772_v57  ;;  %v1725_v59 = vpop.f32.mrf.mxu0 }
 0x1f4   : > { %v2775_v45 = vpop.f32.mrf.mxu1  ;;  %2436 = vst [vmem:[%s4224_s19 + $0x108] sm:$0xff] %v2340_v61  ;;  %v2341_v62 = vmax.f32 %v1722_v9, 0.0  ;;  %v1726_v26 = vadd.f32 %v1725_v59, %v4796_v48  ;;  %v4807_v48 = vld [vmem:[#allocation55_spill] sm:$0xff] }
 0x1f5   : > { %v1727_v54 = vpop.f32.mrf.mxu0 }
 0x1f6   : > { %v2776_v7 = vpop.f32.mrf.mxu1  ;;  %2437 = vst [vmem:[%s4224_s19 + $0x110] sm:$0xff] %v2341_v62  ;;  %v2343_v1 = vmax.f32 %v1726_v26, 0.0  ;;  %v1728_v58 = vadd.f32 %v1727_v54, %v4797_v37 }
 0x1f7   : > { %v4332_v19 = vadd.f32 %v2776_v7, %v2775_v45  ;;  %v1729_v51 = vpop.f32.mrf.mxu0 }
 0x1f8   : > { %v2778_v27 = vpop.f32.mrf.mxu1  ;;  %2439 = vst [vmem:[%s4224_s19 + $0x120] sm:$0xff] %v2343_v1  ;;  %v2344_v44 = vmax.f32 %v1728_v58, 0.0  ;;  %v1730_v60 = vadd.f32 %v1729_v51, %v4798_v18  ;;  %v4808_v58 = vld [vmem:[#allocation56_spill] sm:$0xff] }
 0x1f9   : > { %v1731_v53 = vpop.f32.mrf.mxu0 }
 0x1fa   : > { %v2779_v0 = vpop.f32.mrf.mxu1  ;;  %2440 = vst [vmem:[%s4224_s19 + $0x128] sm:$0xff] %v2344_v44  ;;  %v2346_v24 = vmax.f32 %v1730_v60, 0.0  ;;  %v1732_v15 = vadd.f32 %v1731_v53, %v4799_v32  ;;  %v4809_v60 = vld [vmem:[#allocation57_spill] sm:$0xff] }
 0x1fb   : > { %v4338_v8 = vadd.f32 %v2779_v0, %v2778_v27  ;;  %v1735_v49 = vpop.f32.mrf.mxu0 }
 0x1fc   : > { %v2781_v11 = vpop.f32.mrf.mxu1  ;;  %2442 = vst [vmem:[%s4224_s19 + $0x138] sm:$0xff] %v2346_v24  ;;  %v2347_v33 = vmax.f32 %v1732_v15, 0.0  ;;  %v1736_v16 = vadd.f32 %v1735_v49, %v4800_v52  ;;  %v4810_v49 = vld [vmem:[#allocation58_spill] sm:$0xff] }
 0x1fd   : > { %v1737_v43 = vpop.f32.mrf.mxu0 }
 0x1fe   : > { %v2782_v23 = vpop.f32.mrf.mxu1  ;;  %2443 = vst [vmem:[%s4224_s19 + $0x140] sm:$0xff] %v2347_v33  ;;  %v2349_v50 = vmax.f32 %v1736_v16, 0.0  ;;  %v1738_v30 = vadd.f32 %v1737_v43, %v4801_v12  ;;  %v4811_v43 = vld [vmem:[#allocation59_spill] sm:$0xff] }
 0x1ff   : > { %v4344_v56 = vadd.f32 %v2782_v23, %v2781_v11  ;;  %v1739_v31 = vpop.f32.mrf.mxu0 }
 0x200   : > { %v2784_v5 = vpop.f32.mrf.mxu1  ;;  %2445 = vst [vmem:[%s4224_s19 + $0x150] sm:$0xff] %v2349_v50  ;;  %v2350_v22 = vmax.f32 %v1738_v30, 0.0  ;;  %v1740_v10 = vadd.f32 %v1739_v31, %v4802_v38 }
 0x201   : > { %v1741_v14 = vpop.f32.mrf.mxu0 }
 0x202   : > { %v2785_v39 = vpop.f32.mrf.mxu1  ;;  %2446 = vst [vmem:[%s4224_s19 + $0x158] sm:$0xff] %v2350_v22  ;;  %v2352_v63 = vmax.f32 %v1740_v10, 0.0  ;;  %v1742_v2 = vadd.f32 %v1741_v14, %v4803_v42 }
 0x203   : > { %v4350_v3 = vadd.f32 %v2785_v39, %v2784_v5  ;;  %v1745_v36 = vpop.f32.mrf.mxu0  ;;  %v4812_v5 = vld [vmem:[#allocation60_spill] sm:$0xff]  ;;  %v4813_v39 = vld [vmem:[#allocation61_spill] sm:$0xff] }
 0x204   : > { %v2787_v4 = vpop.f32.mrf.mxu1  ;;  %2448 = vst [vmem:[%s4224_s19 + $0x168] sm:$0xff] %v2352_v63  ;;  %v2353_v46 = vmax.f32 %v1742_v2, 0.0  ;;  %v1746_v28 = vadd.f32 %v1745_v36, %v4804_v6 }
 0x205   : > { %v1747_v34 = vpop.f32.mrf.mxu0 }
 0x206   : > { %v2788_v20 = vpop.f32.mrf.mxu1  ;;  %2449 = vst [vmem:[%s4224_s19 + $0x170] sm:$0xff] %v2353_v46  ;;  %v2355_v57 = vmax.f32 %v1746_v28, 0.0  ;;  %v1748_v25 = vadd.f32 %v1747_v34, %v4805_v47  ;;  %v4814_v46 = vld [vmem:[#allocation62_spill] sm:$0xff] }
 0x207   : > { %v4356_v29 = vadd.f32 %v2788_v20, %v2787_v4  ;;  %v1749_v17 = vpop.f32.mrf.mxu0 }
 0x208   : > { %v2790_v35 = vpop.f32.mrf.mxu1  ;;  %2451 = vst [vmem:[%s4224_s19 + $0x180] sm:$0xff] %v2355_v57  ;;  %v2356_v61 = vmax.f32 %v1748_v25, 0.0  ;;  %v1750_v9 = vadd.f32 %v1749_v17, %v4806_v13  ;;  %v4815_v57 = vld [vmem:[#allocation63_spill] sm:$0xff] }
 0x209   : > { %v1751_v59 = vpop.f32.mrf.mxu0  ;;  %v4816_v13 = vld [vmem:[#allocation11_spill] sm:$0xff] }
 0x20a   : > { %v2791_v45 = vpop.f32.mrf.mxu1  ;;  %2452 = vst [vmem:[%s4224_s19 + $0x188] sm:$0xff] %v2356_v61  ;;  %v2358_v62 = vmax.f32 %v1750_v9, 0.0  ;;  %v1752_v26 = vadd.f32 %v1751_v59, %v4807_v48  ;;  %v4817_v48 = vld [vmem:[#allocation12_spill] sm:$0xff] }
 0x20b   : > { %v4362_v54 = vadd.f32 %v2791_v45, %v2790_v35  ;;  %v1755_v7 = vpop.f32.mrf.mxu0 }
 0x20c   : > { %v2793_v1 = vpop.f32.mrf.mxu1  ;;  %2454 = vst [vmem:[%s4224_s19 + $0x198] sm:$0xff] %v2358_v62  ;;  %v2359_v37 = vmax.f32 %v1752_v26, 0.0  ;;  %v1756_v51 = vadd.f32 %v1755_v7, %v4808_v58 }
 0x20d   : > { %v1757_v27 = vpop.f32.mrf.mxu0 }
 0x20e   : > { %v2794_v44 = vpop.f32.mrf.mxu1  ;;  %2455 = vst [vmem:[%s4224_s19 + $0x1a0] sm:$0xff] %v2359_v37  ;;  %v2361_v18 = vmax.f32 %v1756_v51, 0.0  ;;  %v1758_v53 = vadd.f32 %v1757_v27, %v4809_v60  ;;  %v4818_v51 = vld [vmem:[#allocation28_spill] sm:$0xff] }
 0x20f   : > { %v4368_v0 = vadd.f32 %v2794_v44, %v2793_v1  ;;  %v1759_v24 = vpop.f32.mrf.mxu0 }
 0x210   : > { %v2796_v32 = vpop.f32.mrf.mxu1  ;;  %2457 = vst [vmem:[%s4224_s19 + $0x1b0] sm:$0xff] %v2361_v18  ;;  %v2362_v15 = vmax.f32 %v1758_v53, 0.0  ;;  %v1760_v11 = vadd.f32 %v1759_v24, %v4810_v49  ;;  %v4819_v53 = vld [vmem:[#allocation64_spill] sm:$0xff] }
 0x211   : > { %v1761_v33 = vpop.f32.mrf.mxu0 }
 0x212   : > { %v2797_v52 = vpop.f32.mrf.mxu1  ;;  %2458 = vst [vmem:[%s4224_s19 + $0x1b8] sm:$0xff] %v2362_v15  ;;  %v2364_v16 = vmax.f32 %v1760_v11, 0.0  ;;  %v1762_v23 = vadd.f32 %v1761_v33, %v4811_v43 }
 0x213   : > { %v4374_v50 = vadd.f32 %v2797_v52, %v2796_v32  ;;  %v1765_v12 = vpop.f32.mrf.mxu0 }
 0x214   : > { %v2799_v30 = vpop.f32.mrf.mxu1  ;;  %2460 = vst [vmem:[%s4224_s19 + $0x1c8] sm:$0xff] %v2364_v16  ;;  %v2365_v31 = vmax.f32 %v1762_v23, 0.0  ;;  %v1766_v22 = vadd.f32 %v1765_v12, %v4812_v5 }
 0x215   : > { %v1767_v38 = vpop.f32.mrf.mxu0 }
 0x216   : > { %v2800_v10 = vpop.f32.mrf.mxu1  ;;  %2461 = vst [vmem:[%s4224_s19 + $0x1d0] sm:$0xff] %v2365_v31  ;;  %v2367_v14 = vmax.f32 %v1766_v22, 0.0  ;;  %v1768_v63 = vadd.f32 %v1767_v38, %v4813_v39 }
 0x217   : > { %v4380_v42 = vadd.f32 %v2800_v10, %v2799_v30  ;;  %v1769_v2 = vpop.f32.mrf.mxu0 }
 0x218   : > { %v2802_v36 = vpop.f32.mrf.mxu1  ;;  %2463 = vst [vmem:[%s4224_s19 + $0x1e0] sm:$0xff] %v2367_v14  ;;  %v2368_v4 = vmax.f32 %v1768_v63, 0.0  ;;  %v1770_v6 = vadd.f32 %v1769_v2, %v4814_v46 }
 0x219   : > { %v1771_v28 = vpop.f32.mrf.mxu0 }
 0x21a   : > { %v2803_v34 = vpop.f32.mrf.mxu1  ;;  %2464 = vst [vmem:[%s4224_s19 + $0x1e8] sm:$0xff] %v2368_v4  ;;  %v2370_v20 = vmax.f32 %v1770_v6, 0.0  ;;  %v1772_v47 = vadd.f32 %v1771_v28, %v4815_v57 }
 0x21b   : > { %v4386_v25 = vadd.f32 %v2803_v34, %v2802_v36  ;;  %v1775_v17 = vpop.f32.mrf.mxu0 }
 0x21c   : > { %v2805_v35 = vpop.f32.mrf.mxu1  ;;  %2466 = vst [vmem:[%s4224_s19 + $0x1f8] sm:$0xff] %v2370_v20  ;;  %v2371_v61 = vmax.f32 %v1772_v47, 0.0  ;;  %v1776_v9 = vadd.f32 %v1775_v17, %v4816_v13 }
 0x21d   : > { %v1777_v59 = vpop.f32.mrf.mxu0 }
 0x21e   : > { %v2806_v45 = vpop.f32.mrf.mxu1  ;;  %2467 = vst [vmem:[%s4224_s19 + $0x200] sm:$0xff] %v2371_v61  ;;  %v2373_v62 = vmax.f32 %v1776_v9, 0.0  ;;  %v1778_v26 = vadd.f32 %v1777_v59, %v4817_v48 }
 0x21f   : > { %v4392_v7 = vadd.f32 %v2806_v45, %v2805_v35  ;;  %v1779_v1 = vpop.f32.mrf.mxu0 }
 0x220   : > { %v2808_v37 = vpop.f32.mrf.mxu1  ;;  %2469 = vst [vmem:[%s4224_s19 + $0x210] sm:$0xff] %v2373_v62  ;;  %v2374_v58 = vmax.f32 %v1778_v26, 0.0  ;;  %v1780_v27 = vadd.f32 %v1779_v1, %v4818_v51 }
 0x221   : > { %v1781_v44 = vpop.f32.mrf.mxu0 }
 0x222   : > { %v2809_v18 = vpop.f32.mrf.mxu1  ;;  %2470 = vst [vmem:[%s4224_s19 + $0x218] sm:$0xff] %v2374_v58  ;;  %v2376_v60 = vmax.f32 %v1780_v27, 0.0  ;;  %v1782_v24 = vadd.f32 %v1781_v44, %v4819_v53 }
 0x223   : > { %v4398_v32 = vadd.f32 %v2809_v18, %v2808_v37  ;;  %v4400_v49 = vpop.f32.mrf.mxu0 }
 0x224   : > { %v2811_v15 = vpop.f32.mrf.mxu1  ;;  %2472 = vst [vmem:[%s4224_s19 + $0x228] sm:$0xff] %v2376_v60  ;;  %v2377_v11 = vmax.f32 %v1782_v24, 0.0 }
 0x225   : > { %v4403_v52 = vpop.f32.mrf.mxu0 }
 0x226   : > { %v2812_v33 = vpop.f32.mrf.mxu1  ;;  %2473 = vst [vmem:[%s4224_s19 + $0x230] sm:$0xff] %v2377_v11 }
 0x227   : > { %v4406_v16 = vadd.f32 %v2812_v33, %v2811_v15  ;;  %v4408_v23 = vpop.f32.mrf.mxu0 }
 0x228   : > { %v2814_v43 = vpop.f32.mrf.mxu1 }
 0x229   : > { %v4410_v30 = vpop.f32.mrf.mxu0 }
 0x22a   : > { %v2815_v12 = vpop.f32.mrf.mxu1 }
 0x22b   : > { %v4412_v31 = vadd.f32 %v2815_v12, %v2814_v43  ;;  %v4414_v22 = vpop.f32.mrf.mxu0 }
 0x22c   : > { %v2817_v5 = vpop.f32.mrf.mxu1 }
 0x22d   : > { %v2882_v10 = vpop.f32.mrf.mxu0 }
 0x22e   : > { %v2818_v38 = vpop.f32.mrf.mxu1 }
 0x22f   : > { %v4416_v14 = vadd.f32 %v2818_v38, %v2817_v5  ;;  %v4418_v63 = vpop.f32.mrf.mxu0 }
 0x230   : > { %v2820_v39 = vpop.f32.mrf.mxu1 }
 0x231   : > { %v4420_v36 = vpop.f32.mrf.mxu0 }
 0x232   : > { %v2821_v2 = vpop.f32.mrf.mxu1 }
 0x233   : > { %v4422_v4 = vadd.f32 %v2821_v2, %v2820_v39  ;;  %v4424_v6 = vpop.f32.mrf.mxu0 }
 0x234   : > { %v2823_v46 = vpop.f32.mrf.mxu1 }
 0x235   : > { %v4426_v34 = vpop.f32.mrf.mxu0 }
 0x236   : > { %v2824_v28 = vpop.f32.mrf.mxu1 }
 0x237   : > { %v4428_v20 = vadd.f32 %v2824_v28, %v2823_v46  ;;  %v4430_v47 = vpop.f32.mrf.mxu0 }
 0x238   : > { %v2826_v57 = vpop.f32.mrf.mxu1 }
 0x239   : > { %4820 = vst [vmem:[#allocation13_spill] sm:$0xff] %v4428_v20  ;;  %v4432_v35 = vpop.f32.mrf.mxu0 }
 0x23a   : > { %v2827_v17 = vpop.f32.mrf.mxu1 }
 0x23b   : > { %v4434_v61 = vadd.f32 %v2827_v17, %v2826_v57  ;;  %v2893_v9 = vpop.f32.mrf.mxu0 }
 0x23c   : > { %v2829_v13 = vpop.f32.mrf.mxu1 }
 0x23d   : > { %4821 = vst [vmem:[#allocation30_spill] sm:$0xff] %v4434_v61  ;;  %v2894_v45 = vpop.f32.mrf.mxu0 }
 0x23e   : > { %v2830_v59 = vpop.f32.mrf.mxu1  ;;  %v2895_v20 = vadd.f32 %v2894_v45, %v2893_v9 }
 0x23f   : > { %v4436_v62 = vadd.f32 %v2830_v59, %v2829_v13  ;;  %v4438_v26 = vpop.f32.mrf.mxu0 }
 0x240   : > { %v2832_v48 = vpop.f32.mrf.mxu1 }
 0x241   : > { %v4440_v37 = vpop.f32.mrf.mxu0 }
 0x242   : > { %v2833_v1 = vpop.f32.mrf.mxu1  ;;  %v2898_v9 = vadd.f32 %v4440_v37, %v4438_v26 }
 0x243   : > { %v4442_v58 = vadd.f32 %v2833_v1, %v2832_v48  ;;  %v4444_v27 = vpop.f32.mrf.mxu0 }
 0x244   : > { %v2835_v51 = vpop.f32.mrf.mxu1  ;;  %v2047_v37 = vadd.f32 %v2898_v9, %v4350_v3 }
 0x245   : > { %4822 = vst [vmem:[#allocation14_spill] sm:$0xff] %v4442_v58  ;;  %v4446_v18 = vpop.f32.mrf.mxu0 }
 0x246   : > { %v2836_v44 = vpop.f32.mrf.mxu1 }
 0x247   : > { %v4448_v60 = vadd.f32 %v2836_v44, %v2835_v51  ;;  %v4450_v24 = vpop.f32.mrf.mxu0 }
 0x248   : > { %v2838_v53 = vpop.f32.mrf.mxu1 }
 0x249   : > { %4823 = vst [vmem:[#allocation15_spill] sm:$0xff] %v4448_v60  ;;  %v4452_v11 = vpop.f32.mrf.mxu0 }
 0x24a   : > { %v2839_v15 = vpop.f32.mrf.mxu1 }
 0x24b   : > { %v4454_v33 = vadd.f32 %v2839_v15, %v2838_v53  ;;  %v4456_v12 = vpop.f32.mrf.mxu0 }
 0x24c   : > { %v2841_v43 = vpop.f32.mrf.mxu1 }
 0x24d   : > { %4824 = vst [vmem:[#allocation16_spill] sm:$0xff] %v4454_v33  ;;  %v4458_v38 = vpop.f32.mrf.mxu0 }
 0x24e   : > { %v2842_v5 = vpop.f32.mrf.mxu1  ;;  %v2907_v26 = vadd.f32 %v4458_v38, %v4456_v12 }
 0x24f   : > { %v4460_v39 = vadd.f32 %v2842_v5, %v2841_v43  ;;  %v4462_v46 = vpop.f32.mrf.mxu0 }
 0x250   : > { %v2844_v2 = vpop.f32.mrf.mxu1 }
 0x251   : > { %4825 = vst [vmem:[#allocation17_spill] sm:$0xff] %v4460_v39  ;;  %v4464_v57 = vpop.f32.mrf.mxu0 }
 0x252   : > { %v2845_v28 = vpop.f32.mrf.mxu1  ;;  %v2910_v12 = vadd.f32 %v4464_v57, %v4462_v46 }
 0x253   : > { %v4466_v17 = vadd.f32 %v2845_v28, %v2844_v2  ;;  %v4468_v59 = vpop.f32.mrf.mxu0 }
 0x254   : > { %v2847_v13 = vpop.f32.mrf.mxu1 }
 0x255   : > { %4826 = vst [vmem:[#allocation18_spill] sm:$0xff] %v4466_v17  ;;  %v4470_v1 = vpop.f32.mrf.mxu0  ;;  %v2883_v17 = vadd.f32 %v2882_v10, %v4414_v22 }
 0x256   : > { %v2848_v48 = vpop.f32.mrf.mxu1 }
 0x257   : > { %v4472_v51 = vadd.f32 %v2848_v48, %v2847_v13  ;;  %v4474_v53 = vpop.f32.mrf.mxu0 }
 0x258   : > { %v2850_v44 = vpop.f32.mrf.mxu1 }
 0x259   : > { %4827 = vst [vmem:[#allocation19_spill] sm:$0xff] %v4472_v51  ;;  %v4476_v43 = vpop.f32.mrf.mxu0  ;;  %v2877_v51 = vadd.f32 %v4403_v52, %v4400_v49 }
 0x25a   : > { %v2851_v15 = vpop.f32.mrf.mxu1 }
 0x25b   : > { %v4478_v5 = vadd.f32 %v2851_v15, %v2850_v44  ;;  %v4480_v60 = vpop.f32.mrf.mxu0  ;;  %v2886_v44 = vadd.f32 %v4420_v36, %v4418_v63  ;;  %v2020_v49 = vadd.f32 %v2877_v51, %v4308_v55 }
 0x25c   : > { %v2853_v33 = vpop.f32.mrf.mxu1 }
 0x25d   : > { %4828 = vst [vmem:[#allocation20_spill] sm:$0xff] %v4478_v5  ;;  %v4482_v28 = vpop.f32.mrf.mxu0  ;;  %v2028_v5 = vadd.f32 %v2883_v17, %v4320_v40  ;;  %v2889_v17 = vadd.f32 %v4426_v34, %v4424_v6  ;;  %v2892_v34 = vadd.f32 %v4432_v35, %v4430_v47  ;;  %v2901_v47 = vadd.f32 %v4446_v18, %v4444_v27 }
 0x25e   : > { %v2854_v2 = vpop.f32.mrf.mxu1  ;;  %v2904_v27 = vadd.f32 %v4452_v11, %v4450_v24  ;;  %v2919_v57 = vadd.f32 %v4482_v28, %v4480_v60  ;;  %v2913_v11 = vadd.f32 %v4470_v1, %v4468_v59  ;;  %v2916_v59 = vadd.f32 %v4476_v43, %v4474_v53 }
 0x25f   : > { %v4485_v39 = vadd.f32 %v2854_v2, %v2853_v33  ;;  %v4487_v48 = vpop.f32.mrf.mxu0  ;;  %v2880_v33 = vadd.f32 %v4410_v30, %v4408_v23 }
 0x260   : > { %v2856_v13 = vpop.f32.mrf.mxu1 }
 0x261   : > { %4829 = vst [vmem:[#allocation21_spill] sm:$0xff] %v4485_v39  ;;  %v4491_v58 = vpop.f32.mrf.mxu0  ;;  %v2023_v55 = vadd.f32 %v2880_v33, %v4314_v41  ;;  %v2036_v33 = vadd.f32 %v2889_v17, %v4332_v19 }
 0x262   : > { %v2857_v61 = vpop.f32.mrf.mxu1  ;;  %v2922_v28 = vadd.f32 %v4491_v58, %v4487_v48 }
 0x263   : > { %v4495_v15 = vadd.f32 %v2857_v61, %v2856_v13  ;;  %v4498_v22 = vpop.f32.mrf.mxu0  ;;  %v2031_v61 = vadd.f32 %v2886_v44, %v4326_v21 }
 0x264   : > { %v3013_v10 = vpop.f32.mrf.mxu1 }
 0x265   : > { %v2189_v2 = vadd.f32 %v3013_v10, %v2028_v5  ;;  %v4503_v52 = vpop.f32.mrf.mxu0 }
 0x266   : > { %v2180_v39 = vpop.f32.mrf.mxu1  ;;  %v2925_v53 = vadd.f32 %v4503_v52, %v4498_v22 }
 0x267   : > { %v2315_v63 = vmax.f32 %v2189_v2, 0.0  ;;  %v2181_v36 = vadd.f32 %v2180_v39, %v2020_v49  ;;  %v4506_v13 = vpop.f32.mrf.mxu0  ;;  %v2044_v39 = vadd.f32 %v2895_v20, %v4344_v56 }
 0x268   : > { %v3014_v40 = vpop.f32.mrf.mxu1 }
 0x269   : > { %2411 = vst [vmem:[%s4224_s19 + $0x40] sm:$0xff] %v2315_v63  ;;  %v2309_v23 = vmax.f32 %v2181_v36, 0.0  ;;  %v2192_v30 = vadd.f32 %v3014_v40, %v2031_v61  ;;  %v4512_v51 = vpop.f32.mrf.mxu0  ;;  %v2039_v61 = vadd.f32 %v2892_v34, %v4338_v8  ;;  %v2055_v34 = vadd.f32 %v2904_v27, %v4362_v54 }
 0x26a   : > { %v2183_v5 = vpop.f32.mrf.mxu1  ;;  %v2928_v22 = vadd.f32 %v4512_v51, %v4506_v13 }
 0x26b   : > { %2405 = vst [vmem:[%s4224_s19 + $0x10] sm:$0xff] %v2309_v23  ;;  %v2318_v21 = vmax.f32 %v2192_v30, 0.0  ;;  %v2184_v45 = vadd.f32 %v2183_v5, %v2023_v55  ;;  %v4518_v44 = vpop.f32.mrf.mxu0  ;;  %v2060_v23 = vadd.f32 %v2907_v26, %v4368_v0  ;;  %v2052_v5 = vadd.f32 %v2901_v47, %v4356_v29 }
 0x26c   : > { %v3017_v6 = vpop.f32.mrf.mxu1 }
 0x26d   : > { %2414 = vst [vmem:[%s4224_s19 + $0x58] sm:$0xff] %v2318_v21  ;;  %v2312_v41 = vmax.f32 %v2184_v45, 0.0  ;;  %v2205_v10 = vadd.f32 %v3017_v6, %v2044_v39  ;;  %v2930_v2 = vpop.f32.mrf.mxu0  ;;  %v2063_v45 = vadd.f32 %v2910_v12, %v4374_v50 }
 0x26e   : > { %v2196_v49 = vpop.f32.mrf.mxu1  ;;  %v2931_v58 = vadd.f32 %v2930_v2, %v4518_v44 }
 0x26f   : > { %2408 = vst [vmem:[%s4224_s19 + $0x28] sm:$0xff] %v2312_v41  ;;  %v2327_v56 = vmax.f32 %v2205_v10, 0.0  ;;  %v2197_v20 = vadd.f32 %v2196_v49, %v2036_v33  ;;  %v4528_v63 = vpop.f32.mrf.mxu0  ;;  %v2076_v33 = vadd.f32 %v2919_v57, %v4392_v7  ;;  %v2079_v7 = vadd.f32 %v2922_v28, %v4398_v32 }
 0x270   : > { %v3018_v36 = vpop.f32.mrf.mxu1  ;;  %v2092_v32 = vadd.f32 %v2931_v58, %v4416_v14 }
 0x271   : > { %2423 = vst [vmem:[%s4224_s19 + $0xa0] sm:$0xff] %v2327_v56  ;;  %v2321_v19 = vmax.f32 %v2197_v20, 0.0  ;;  %v2208_v35 = vadd.f32 %v3018_v36, %v2047_v37  ;;  %v2933_v40 = vpop.f32.mrf.mxu0  ;;  %v2068_v56 = vadd.f32 %v2913_v11, %v4380_v42  ;;  %v2071_v42 = vadd.f32 %v2916_v59, %v4386_v25 }
 0x272   : > { %v2199_v17 = vpop.f32.mrf.mxu1  ;;  %v2934_v44 = vadd.f32 %v2933_v40, %v4528_v63  ;;  %v2084_v25 = vadd.f32 %v2925_v53, %v4406_v16  ;;  %v2087_v16 = vadd.f32 %v2928_v22, %v4412_v31 }
 0x273   : > { %2417 = vst [vmem:[%s4224_s19 + $0x70] sm:$0xff] %v2321_v19  ;;  %v2330_v3 = vmax.f32 %v2208_v35, 0.0  ;;  %v2200_v38 = vadd.f32 %v2199_v17, %v2039_v61  ;;  %v4538_v30 = vpop.f32.mrf.mxu0 }
 0x274   : > { %v3021_v55 = vpop.f32.mrf.mxu1  ;;  %v2095_v14 = vadd.f32 %v2934_v44, %v4422_v4 }
 0x275   : > { %2426 = vst [vmem:[%s4224_s19 + $0xb8] sm:$0xff] %v2330_v3  ;;  %v2324_v8 = vmax.f32 %v2200_v38, 0.0  ;;  %v2221_v18 = vadd.f32 %v3021_v55, %v2060_v23  ;;  %v4544_v9 = vpop.f32.mrf.mxu0 }
 0x276   : > { %v2212_v46 = vpop.f32.mrf.mxu1  ;;  %v2937_v13 = vadd.f32 %v4544_v9, %v4538_v30 }
 0x277   : > { %2420 = vst [vmem:[%s4224_s19 + $0x88] sm:$0xff] %v2324_v8  ;;  %v2339_v0 = vmax.f32 %v2221_v18, 0.0  ;;  %v2213_v21 = vadd.f32 %v2212_v46, %v2052_v5  ;;  %v4550_v39 = vpop.f32.mrf.mxu0 }
 0x278   : > { %v3022_v24 = vpop.f32.mrf.mxu1 }
 0x279   : > { %2435 = vst [vmem:[%s4224_s19 + $0x100] sm:$0xff] %v2339_v0  ;;  %v2333_v29 = vmax.f32 %v2213_v21, 0.0  ;;  %v2224_v6 = vadd.f32 %v3022_v24, %v2063_v45  ;;  %v4556_v41 = vpop.f32.mrf.mxu0 }
 0x27a   : > { %v2215_v60 = vpop.f32.mrf.mxu1  ;;  %v2940_v30 = vadd.f32 %v4556_v41, %v4550_v39 }
 0x27b   : > { %2429 = vst [vmem:[%s4224_s19 + $0xd0] sm:$0xff] %v2333_v29  ;;  %v2342_v50 = vmax.f32 %v2224_v6, 0.0  ;;  %v2216_v10 = vadd.f32 %v2215_v60, %v2055_v34  ;;  %v2941_v49 = vpop.f32.mrf.mxu0  ;;  %v4830_v34 = vld [vmem:[#allocation13_spill] sm:$0xff] }
 0x27c   : > { %v3025_v26 = vpop.f32.mrf.mxu1  ;;  %v2100_v31 = vadd.f32 %v2937_v13, %v4830_v34 }
 0x27d   : > { %2438 = vst [vmem:[%s4224_s19 + $0x118] sm:$0xff] %v2342_v50  ;;  %v2336_v54 = vmax.f32 %v2216_v10, 0.0  ;;  %v2237_v1 = vadd.f32 %v3025_v26, %v2076_v33  ;;  %v2942_v20 = vpop.f32.mrf.mxu0 }
 0x27e   : > { %v2228_v37 = vpop.f32.mrf.mxu1  ;;  %v2943_v63 = vadd.f32 %v2942_v20, %v2941_v49  ;;  %v4831_v49 = vld [vmem:[#allocation14_spill] sm:$0xff] }
 0x27f   : > { %2432 = vst [vmem:[%s4224_s19 + $0xe8] sm:$0xff] %v2336_v54  ;;  %v2351_v48 = vmax.f32 %v2237_v1, 0.0  ;;  %v2229_v36 = vadd.f32 %v2228_v37, %v2068_v56  ;;  %v2944_v47 = vpop.f32.mrf.mxu0  ;;  %v4832_v1 = vld [vmem:[#allocation30_spill] sm:$0xff] }
 0x280   : > { %v3026_v19 = vpop.f32.mrf.mxu1  ;;  %v2108_v4 = vadd.f32 %v2943_v63, %v4436_v62  ;;  %v2103_v56 = vadd.f32 %v2940_v30, %v4832_v1 }
 0x281   : > { %2447 = vst [vmem:[%s4224_s19 + $0x160] sm:$0xff] %v2351_v48  ;;  %v2345_v43 = vmax.f32 %v2229_v36, 0.0  ;;  %v2240_v35 = vadd.f32 %v3026_v19, %v2079_v7  ;;  %v2945_v61 = vpop.f32.mrf.mxu0  ;;  %v4833_v7 = vld [vmem:[#allocation17_spill] sm:$0xff] }
 0x282   : > { %v2231_v17 = vpop.f32.mrf.mxu1  ;;  %v2946_v21 = vadd.f32 %v2945_v61, %v2944_v47  ;;  %v4834_v61 = vld [vmem:[#allocation15_spill] sm:$0xff] }
 0x283   : > { %2441 = vst [vmem:[%s4224_s19 + $0x130] sm:$0xff] %v2345_v43  ;;  %v2354_v2 = vmax.f32 %v2240_v35, 0.0  ;;  %v2232_v12 = vadd.f32 %v2231_v17, %v2071_v42  ;;  %v2947_v3 = vpop.f32.mrf.mxu0 }
 0x284   : > { %v3029_v38 = vpop.f32.mrf.mxu1  ;;  %v2111_v62 = vadd.f32 %v2946_v21, %v4831_v49 }
 0x285   : > { %2450 = vst [vmem:[%s4224_s19 + $0x178] sm:$0xff] %v2354_v2  ;;  %v2348_v52 = vmax.f32 %v2232_v12, 0.0  ;;  %v2253_v23 = vadd.f32 %v3029_v38, %v2092_v32  ;;  %v2948_v55 = vpop.f32.mrf.mxu0 }
 0x286   : > { %v2244_v27 = vpop.f32.mrf.mxu1  ;;  %v2949_v54 = vadd.f32 %v2948_v55, %v2947_v3  ;;  %v4835_v3 = vld [vmem:[#allocation18_spill] sm:$0xff] }
 0x287   : > { %2444 = vst [vmem:[%s4224_s19 + $0x148] sm:$0xff] %v2348_v52  ;;  %v2363_v40 = vmax.f32 %v2253_v23, 0.0  ;;  %v2245_v8 = vadd.f32 %v2244_v27, %v2084_v25  ;;  %v2950_v18 = vpop.f32.mrf.mxu0  ;;  %v4836_v27 = vld [vmem:[#allocation16_spill] sm:$0xff] }
 0x288   : > { %v3030_v5 = vpop.f32.mrf.mxu1  ;;  %v2116_v17 = vadd.f32 %v2949_v54, %v4834_v61 }
 0x289   : > { %2459 = vst [vmem:[%s4224_s19 + $0x1c0] sm:$0xff] %v2363_v40  ;;  %v2357_v51 = vmax.f32 %v2245_v8, 0.0  ;;  %v2256_v46 = vadd.f32 %v3030_v5, %v2095_v14  ;;  %v2951_v57 = vpop.f32.mrf.mxu0 }
 0x28a   : > { %v2247_v0 = vpop.f32.mrf.mxu1  ;;  %v2952_v43 = vadd.f32 %v2951_v57, %v2950_v18 }
 0x28b   : > { %2453 = vst [vmem:[%s4224_s19 + $0x190] sm:$0xff] %v2357_v51  ;;  %v2366_v45 = vmax.f32 %v2256_v46, 0.0  ;;  %v2248_v24 = vadd.f32 %v2247_v0, %v2087_v16  ;;  %v2953_v11 = vpop.f32.mrf.mxu0  ;;  %v4837_v16 = vld [vmem:[#allocation19_spill] sm:$0xff] }
 0x28c   : > { %v3033_v29 = vpop.f32.mrf.mxu1  ;;  %v2119_v63 = vadd.f32 %v2952_v43, %v4836_v27 }
 0x28d   : > { %2462 = vst [vmem:[%s4224_s19 + $0x1d8] sm:$0xff] %v2366_v45  ;;  %v2360_v9 = vmax.f32 %v2248_v24, 0.0  ;;  %v2269_v6 = vadd.f32 %v3033_v29, %v2108_v4  ;;  %v2954_v60 = vpop.f32.mrf.mxu0  ;;  %v4838_v29 = vld [vmem:[#allocation21_spill] sm:$0xff] }
 0x28e   : > { %v2260_v28 = vpop.f32.mrf.mxu1  ;;  %v2955_v10 = vadd.f32 %v2954_v60, %v2953_v11 }
 0x28f   : > { %2456 = vst [vmem:[%s4224_s19 + $0x1a8] sm:$0xff] %v2360_v9  ;;  %v2375_v50 = vmax.f32 %v2269_v6, 0.0  ;;  %v2261_v33 = vadd.f32 %v2260_v28, %v2100_v31  ;;  %v2956_v26 = vpop.f32.mrf.mxu0  ;;  %v4839_v6 = vld [vmem:[#allocation20_spill] sm:$0xff] }
 0x290   : > { %v3034_v59 = vpop.f32.mrf.mxu1  ;;  %v2124_v47 = vadd.f32 %v2955_v10, %v4833_v7 }
 0x291   : > { %2471 = vst [vmem:[%s4224_s19 + $0x220] sm:$0xff] %v2375_v50  ;;  %v2369_v39 = vmax.f32 %v2261_v33, 0.0  ;;  %v2272_v41 = vadd.f32 %v3034_v59, %v2111_v62  ;;  %v2957_v20 = vpop.f32.mrf.mxu0 }
 0x292   : > { %v2263_v37 = vpop.f32.mrf.mxu1  ;;  %v2958_v48 = vadd.f32 %v2957_v20, %v2956_v26 }
 0x293   : > { %2465 = vst [vmem:[%s4224_s19 + $0x1f0] sm:$0xff] %v2369_v39  ;;  %v2378_v58 = vmax.f32 %v2272_v41, 0.0  ;;  %v2264_v36 = vadd.f32 %v2263_v37, %v2103_v56  ;;  %v2959_v19 = vpop.f32.mrf.mxu0 }
 0x294   : > { %v3037_v53 = vpop.f32.mrf.mxu1  ;;  %v2127_v38 = vadd.f32 %v2958_v48, %v4835_v3 }
 0x295   : > { %2474 = vst [vmem:[%s4224_s19 + $0x238] sm:$0xff] %v2378_v58  ;;  %v2372_v35 = vmax.f32 %v2264_v36, 0.0  ;;  %v2285_v42 = vadd.f32 %v3037_v53, %v2124_v47  ;;  %v2960_v44 = vpop.f32.mrf.mxu0 }
 0x296   : > { %v2276_v2 = vpop.f32.mrf.mxu1  ;;  %v2961_v23 = vadd.f32 %v2960_v44, %v2959_v19 }
 0x297   : > { %2468 = vst [vmem:[%s4224_s19 + $0x208] sm:$0xff] %v2372_v35  ;;  %v2387_v12 = vmax.f32 %v2285_v42, 0.0  ;;  %v2277_v32 = vadd.f32 %v2276_v2, %v2116_v17  ;;  %v2962_v22 = vpop.f32.mrf.mxu0 }
 0x298   : > { %v3038_v52 = vpop.f32.mrf.mxu1  ;;  %v2132_v57 = vadd.f32 %v2961_v23, %v4837_v16 }
 0x299   : > { %2483 = vst [vmem:[%s4224_s19 + $0x280] sm:$0xff] %v2387_v12  ;;  %v2381_v25 = vmax.f32 %v2277_v32, 0.0  ;;  %v2288_v55 = vadd.f32 %v3038_v52, %v2127_v38  ;;  %v2963_v40 = vpop.f32.mrf.mxu0 }
 0x29a   : > { %v2279_v8 = vpop.f32.mrf.mxu1  ;;  %v2964_v51 = vadd.f32 %v2963_v40, %v2962_v22 }
 0x29b   : > { %2477 = vst [vmem:[%s4224_s19 + $0x250] sm:$0xff] %v2381_v25  ;;  %v2390_v14 = vmax.f32 %v2288_v55, 0.0  ;;  %v2280_v18 = vadd.f32 %v2279_v8, %v2119_v63  ;;  %v2965_v5 = vpop.f32.mrf.mxu0 }
 0x29c   : > { %v3041_v13 = vpop.f32.mrf.mxu1  ;;  %v2135_v34 = vadd.f32 %v2964_v51, %v4839_v6 }
 0x29d   : > { %2486 = vst [vmem:[%s4224_s19 + $0x298] sm:$0xff] %v2390_v14  ;;  %v2384_v46 = vmax.f32 %v2280_v18, 0.0  ;;  %v2966_v0 = vpop.f32.mrf.mxu0 }
 0x29e   : > { %v2292_v21 = vpop.f32.mrf.mxu1  ;;  %v2967_v45 = vadd.f32 %v2966_v0, %v2965_v5 }
 0x29f   : > { %2480 = vst [vmem:[%s4224_s19 + $0x268] sm:$0xff] %v2384_v46  ;;  %v2293_v24 = vadd.f32 %v2292_v21, %v2132_v57  ;;  %v2968_v4 = vpop.f32.mrf.mxu0 }
 0x2a0   : > { %v3042_v11 = vpop.f32.mrf.mxu1  ;;  %v2140_v30 = vadd.f32 %v2967_v45, %v4838_v29 }
 0x2a1   : > { %v2393_v9 = vmax.f32 %v2293_v24, 0.0  ;;  %v2969_v31 = vpop.f32.mrf.mxu0 }
 0x2a2   : > { %v2295_v60 = vpop.f32.mrf.mxu1  ;;  %v2301_v28 = vadd.f32 %v3041_v13, %v2140_v30  ;;  %v2970_v50 = vadd.f32 %v2969_v31, %v2968_v4 }
 0x2a3   : > { %2489 = vst [vmem:[%s4224_s19 + $0x2b0] sm:$0xff] %v2393_v9  ;;  %v2296_v10 = vadd.f32 %v2295_v60, %v2135_v34 }
 0x2a4   : > { %v2399_v33 = vmax.f32 %v2301_v28, 0.0  ;;  %v2143_v49 = vadd.f32 %v2970_v50, %v4495_v15 }
 0x2a5   : > { %v2396_v62 = vmax.f32 %v2296_v10, 0.0 }
 0x2a6   : > { %2495 = vst [vmem:[%s4224_s19 + $0x2e0] sm:$0xff] %v2399_v33  ;;  %v2304_v26 = vadd.f32 %v3042_v11, %v2143_v49 }
 0x2a7   : > { %2492 = vst [vmem:[%s4224_s19 + $0x2c8] sm:$0xff] %v2396_v62 }
 0x2a8   : > { %v2402_v59 = vmax.f32 %v2304_v26, 0.0 }
 0x2aa   : > { %2498 = vst [vmem:[%s4224_s19 + $0x2f8] sm:$0xff] %v2402_v59 }
 0x2ab   : > { %3371 = shalt.err (!%p3368_p5)
}
 0x2ac   : > { %s3372_s3 = scalar_lea.hbm %s4619_s26, 12288  ;;  %s3376_s15 = scalar_lea.hbm %s4671_s2, 36864 }
 0x2ad   : > { %p3373_p7 = scmp.ne.s32.totalorder %s4619_s26, %s3372_s3  ;;  %p3377_p11 = scmp.lt.s32.totalorder %s4619_s26, %s4671_s2 }
 0x2ae   : > { %p3378_p12 = scmp.lt.s32.totalorder %s3376_s15, %s3372_s3 }
 0x2af   : > { %p3374_p9 = pnand %p3373_p7, %p3551_p13 }
 0x2b0   : > { %p3379_p0 = por %p3378_p12, %p3377_p11 }
 0x2b1   : > { %p3375_p6 = pneg %p3374_p9 }
 0x2b3   : > { %p3380_p1 = pnand %p3379_p0, %p3375_p6 }
 0x2b5   : > { %3383 = shalt.err (!%p3380_p1)
}
 0x2b6   : > { %s3452_s17 = smov 384   ;;  %s3453_s19 = smov 24  }
 0x2b7   : > { %3070 = dma.vmem_to_hbm [thread:$0]  (%p3551_p13), %s4621_s22, 12288, %s4619_s26, %s2500_s12, %s3452_s17, %s3452_s17, %s3453_s19  }
 0x2b8 PF: > { %p3087_p4 = scmp.ge.s32.totalorder %s3442_s14, 2  ;;  %s2531_s21 = sand.u32 1, %s3422_s9  }
 0x2b9   : > { %p4840_p8 = scmp.ne.s32.totalorder %s4700_s20, 0  ;;  %s2532_s23 = scalar_lea.sflag [#allocation4], %s2531_s21 }
 0x2bb   : > { %p3081_p3 = pnand %p3087_p4, %p4840_p8 }
 0x2bd   : > { %p3082_p10 = pneg %p3081_p3 }
 0x2bf   : > { %3417 = dma.done.wait (%p3082_p10), %s2532_s23, 12288  }
 0x2c0   : > { %3419 = vsyncadd (%p3082_p10), %s2532_s23, 4294955008  ;;  %s19_s14 = sadd.s32 1, %s3442_s14   ;;  %s4841_s9 = smov %s3426_s10 }
 0x2c1   : > { %p16_p2 = scmp.ge.s32.totalorder %s19_s14, 5   ;;  %s4842_s10 = smov %s3430_s11 }
 0x2c2   : > { %s4843_s11 = smov %s3560_s8  ;;  %s4844_s12 = smov %s3438_s13 }
 0x2c3   : > { %s4845_s13 = smov %s4847_s25  ;;  %18 = sbr.rel (!%p16_p2) target bundleno = 7 (0x7), region = 78 }
 0x2c8   :  { %2537 = vsyncpa [#allocation3], 1 }
 0x2c9   :  { %2539 = vsyncpa [#allocation3 + $0x1], 1 }
 0x2ca   :  { %2540 = vsyncpa [#allocation6], 1 }
 0x2cb   :  { %2541 = vsyncpa [#allocation4], 1 }
 0x2cc   :  { %2543 = vsyncpa [#allocation4 + $0x1], 1 }

</bundles_post_ra>
